<compile_context>
chip_gen: v7x
topology: tpu7x:2x2x1
jax: 0.10.0
libtpu: 0.0.40
codegen_flags: <defaults>
</compile_context>

<pallas_src>
import math
import numpy as np
import jax
import jax.numpy as jnp
from jax.experimental import pallas as pl
from jax.experimental.pallas import tpu as pltpu  # noqa: F401  (kept for TPU-specific tuning hooks)

# ----------------------------- model hyper-params (small test sizes) -----------------------------
B = 2            # batch
C = 32           # hidden_size
T = 8            # sequence length
NH = 2           # num_attention_heads
DH = C // NH     # head dim
L = 2            # num_hidden_layers
I = 64           # intermediate_size
OUT = 15         # out_dim (vertices*3 in the real model; small here)
OUT_PAD = 128    # lane-dense padded output width
K = 5            # conv kernel size
PAD = K // 2
NEG = 0.2        # LeakyReLU negative slope
EPS = 1e-5
BT = B * T

# ---- layout of the stacked (NVEC, C) bias/gain table ----
ROW_CONVB = 0
ROW_BEMB = 1
VROW_BQ, VROW_BK, VROW_BV, VROW_BO, VROW_G1, VROW_BE1, VROW_G2, VROW_BE2, VROW_B2 = range(9)
NVEC_PER_LAYER = 9
NVEC = 2 + L * NVEC_PER_LAYER


def _vrow(l, j):
    return 2 + l * NVEC_PER_LAYER + j


# ----------------------------- fused kernel ------------------------------------------------------
def fused_decoder_kernel(xpad_ref, pe_ref, abias_ref, vecc_ref, b1_ref,
                         wconv_ref, wemb_ref, wq_ref, wk_ref, wv_ref, wo_ref,
                         w1_ref, w2_ref, wout_ref, bout_ref, o_ref):
    # xpad_ref : (B, T+K-1, C)   replicate-padded, time-major input
    # pe_ref   : (B*T, C)        positional encoding, tiled over batch
    # abias_ref: (B*T, B*T)      0 / -1e9 block-diagonal bias (per-batch attention on flattened rows)
    # vecc_ref : (NVEC, C)       stacked 1xC biases / LN gains
    # b1_ref   : (L, I)          FFN first-layer biases
    # wconv_ref: (K*C, C)        im2col conv weight
    # wemb_ref : (C, C)          LinearEmbedding weight, (in, out)
    # wq/wk/wv : (L, NH, C, DH)  per-head projection weights, (in, out)
    # wo_ref   : (L, NH, DH, C)  per-head output-projection weights
    # w1_ref   : (L, C, I)   w2_ref: (L, I, C)
    # wout_ref : (C, OUT_PAD)  bout_ref: (1, OUT_PAD)
    # o_ref    : (B*T, OUT_PAD)
    f32 = jnp.float32

    def vc(row):                              # one (1, C) vector from the stacked table
        return vecc_ref[row:row + 1, :]

    # ---- expander: Conv1d (single im2col matmul) + LeakyReLU + InstanceNorm1d ----
    patches = jnp.concatenate(
        [jnp.concatenate([xpad_ref[b, k:k + T, :] for k in range(K)], axis=-1)
         for b in range(B)], axis=0)                                    # (B*T, K*C)
    conv = jnp.dot(patches, wconv_ref[...], preferred_element_type=f32) + vc(ROW_CONVB)
    conv = jnp.maximum(conv, NEG * conv)                                # LeakyReLU(0.2)
    conv3 = conv.reshape(B, T, C)                                       # per-batch, per-channel stats
    mu = jnp.mean(conv3, axis=1, keepdims=True)
    var = jnp.mean((conv3 - mu) ** 2, axis=1, keepdims=True)            # biased var (InstanceNorm1d)
    h = ((conv3 - mu) * jax.lax.rsqrt(var + EPS)).reshape(BT, C)

    # ---- LinearEmbedding * sqrt(d_model) + positional encoding ----
    h = (jnp.dot(h, wemb_ref[...], preferred_element_type=f32) + vc(ROW_BEMB)) * math.sqrt(C)
    h = h + pe_ref[...]

    def layernorm(x, g_row, b_row):
        m = jnp.mean(x, axis=-1, keepdims=True)
        c = x - m
        v = jnp.mean(c * c, axis=-1, keepdims=True)
        return c * jax.lax.rsqrt(v + EPS) * vc(g_row) + vc(b_row)

    inv_sqrt_dh = 1.0 / math.sqrt(DH)
    abias = abias_ref[...]                                              # load once, reuse across layers

    for l in range(L):                                                  # static unroll over layers
        # ---- multi-head self-attention (per-head weights pre-split; block-diagonal batch mask) ----
        attn = None
        for hd in range(NH):                                            # static unroll over heads
            lo = hd * DH
            qh = jnp.dot(h, wq_ref[l, hd], preferred_element_type=f32) + vc(_vrow(l, VROW_BQ))[:, lo:lo + DH]
            kh = jnp.dot(h, wk_ref[l, hd], preferred_element_type=f32) + vc(_vrow(l, VROW_BK))[:, lo:lo + DH]
            vh = jnp.dot(h, wv_ref[l, hd], preferred_element_type=f32) + vc(_vrow(l, VROW_BV))[:, lo:lo + DH]
            s = jax.lax.dot_general(qh, kh, (((1,), (1,)), ((), ())),
                                    preferred_element_type=f32) * inv_sqrt_dh + abias
            s = s - jnp.max(s, axis=-1, keepdims=True)
            p = jnp.exp(s)
            p = p * pl.reciprocal(jnp.sum(p, axis=-1, keepdims=True), approx=True)
            ctx = jnp.dot(p, vh, preferred_element_type=f32)            # (B*T, DH)
            part = jnp.dot(ctx, wo_ref[l, hd], preferred_element_type=f32)
            attn = part if attn is None else attn + part
        attn = attn + vc(_vrow(l, VROW_BO))
        h = layernorm(h + attn, _vrow(l, VROW_G1), _vrow(l, VROW_BE1))

        # ---- feed-forward ----
        ff = jnp.dot(h, w1_ref[l], preferred_element_type=f32) + b1_ref[l:l + 1, :]
        ff = jax.nn.gelu(ff, approximate=True)  # TODO(synk): reference may use exact erf-GELU (diff ~1e-3)
        ff = jnp.dot(ff, w2_ref[l], preferred_element_type=f32) + vc(_vrow(l, VROW_B2))
        h = layernorm(h + ff, _vrow(l, VROW_G2), _vrow(l, VROW_BE2))

    # ---- vertice_map_reverse: lane-dense (padded to 128) store ----
    o_ref[...] = jnp.dot(h, wout_ref[...], preferred_element_type=f32) + bout_ref[...]


# ----------------------------- parameter init (PyTorch layouts) ----------------------------------
def init_params(key):
    def nrm(k, shape, scale=0.02):
        return (scale * jax.random.normal(k, shape)).astype(jnp.float32)

    keys = jax.random.split(key, 12)
    p = {}
    p["conv_w"] = nrm(keys[0], (C, C, K))                  # Conv1d weight (C_out, C_in, K)
    p["conv_b"] = nrm(keys[1], (C,))
    p["wemb"] = nrm(keys[2], (C, C)); p["bemb"] = jnp.zeros((1, C), jnp.float32)
    p["wq"] = nrm(keys[3], (L, C, C)); p["bq"] = jnp.zeros((L, 1, C), jnp.float32)
    p["wk"] = nrm(keys[4], (L, C, C)); p["bk"] = jnp.zeros((L, 1, C), jnp.float32)
    p["wv"] = nrm(keys[5], (L, C, C)); p["bv"] = jnp.zeros((L, 1, C), jnp.float32)
    p["wo"] = nrm(keys[6], (L, C, C)); p["bo"] = jnp.zeros((L, 1, C), jnp.float32)
    p["g1"] = jnp.ones((L, 1, C), jnp.float32); p["be1"] = jnp.zeros((L, 1, C), jnp.float32)
    p["g2"] = jnp.ones((L, 1, C), jnp.float32); p["be2"] = jnp.zeros((L, 1, C), jnp.float32)
    p["w1"] = nrm(keys[7], (L, I, C)); p["b1"] = jnp.zeros((L, 1, I), jnp.float32)
    p["w2"] = nrm(keys[8], (L, C, I)); p["b2"] = jnp.zeros((L, 1, C), jnp.float32)
    p["wout"] = nrm(keys[9], (OUT, C)); p["bout"] = jnp.zeros((1, OUT), jnp.float32)
    return p


def sinusoidal_pe(t, d):
    pos = np.arange(t, dtype=np.float32)[:, None]
    idx = np.arange(0, d, 2, dtype=np.float32)[None, :]
    div = np.exp(-math.log(10000.0) * idx / d)
    pe = np.zeros((t, d), np.float32)
    pe[:, 0::2] = np.sin(pos * div)
    pe[:, 1::2] = np.cos(pos * div)
    return pe


def prepare_inputs(params):
    """One-time, outside-jit layout prep: kernel-ready weights, PE, attention bias, stacked biases."""
    f32 = jnp.float32
    # Conv1d -> im2col weight: column (k*C + c_in) -> out channel.
    wconv = jnp.transpose(params["conv_w"], (2, 1, 0)).reshape(K * C, C).astype(f32)
    wemb = params["wemb"].T.astype(f32)                                 # (in, out)
    # per-head splits; PyTorch Linear weight is (out, in), out index = head*DH + d (head-major)
    wq = params["wq"].reshape(L, NH, DH, C).transpose(0, 1, 3, 2).astype(f32)   # (L, NH, C, DH)
    wk = params["wk"].reshape(L, NH, DH, C).transpose(0, 1, 3, 2).astype(f32)
    wv = params["wv"].reshape(L, NH, DH, C).transpose(0, 1, 3, 2).astype(f32)
    wo = params["wo"].transpose(0, 2, 1).reshape(L, NH, DH, C).astype(f32)      # (L, NH, DH, C)
    w1 = params["w1"].transpose(0, 2, 1).astype(f32)                            # (L, C, I)
    w2 = params["w2"].transpose(0, 2, 1).astype(f32)                            # (L, I, C)
    wout = jnp.zeros((C, OUT_PAD), f32).at[:, :OUT].set(params["wout"].T)       # lane-dense pad
    bout = jnp.zeros((1, OUT_PAD), f32).at[:, :OUT].set(params["bout"][0])
    # stacked (NVEC, C) table of 1xC vectors
    rows = [params["conv_b"].reshape(1, C), params["bemb"].reshape(1, C)]
    for l in range(L):
        rows += [params["bq"][l], params["bk"][l], params["bv"][l], params["bo"][l],
                 params["g1"][l], params["be1"][l], params["g2"][l], params["be2"][l],
                 params["b2"][l]]
    vecc = jnp.concatenate(rows, axis=0).astype(f32)                            # (NVEC, C)
    b1 = params["b1"].reshape(L, I).astype(f32)
    # constants: batch-tiled PE and block-diagonal attention bias over the flattened (B*T) rows
    pe = jnp.asarray(np.tile(sinusoidal_pe(T, C), (B, 1)), f32)                 # (B*T, C)
    rb = np.arange(BT) // T
    abias = jnp.asarray(np.where(rb[:, None] == rb[None, :], 0.0, -1e9), f32)   # (B*T, B*T)
    return (pe, abias, vecc, b1, wconv, wemb, wq, wk, wv, wo, w1, w2, wout, bout)


# ----------------------------- forward -----------------------------------------------------------
@jax.jit
def transformer_decoder_forward(x_ncl, prepped):
    """x_ncl: (B, C, T) — PyTorch Conv1d layout. Returns (B, T, OUT)."""
    (pe, abias, vecc, b1, wconv, wemb, wq, wk, wv, wo, w1, w2, wout, bout) = prepped
    # (B, C, T) -> (B, T, C), replicate-pad the time axis (Conv1d padding_mode='replicate')
    x_pad = jnp.pad(jnp.transpose(x_ncl, (0, 2, 1)),
                    ((0, 0), (PAD, PAD), (0, 0)), mode="edge")          # (B, T+K-1, C)
    out_pad = pl.pallas_call(
        fused_decoder_kernel,
        out_shape=jax.ShapeDtypeStruct((BT, OUT_PAD), jnp.float32),
    )(x_pad, pe, abias, vecc, b1, wconv, wemb, wq, wk, wv, wo, w1, w2, wout, bout)
    return out_pad[:, :OUT].reshape(B, T, OUT)


if __name__ == "__main__":
    key = jax.random.PRNGKey(0)
    k_x, k_p = jax.random.split(key)
    x = jax.random.normal(k_x, (B, C, T), dtype=jnp.float32)   # (batch, hidden_size, seq_len)
    params = init_params(k_p)
    prepped = prepare_inputs(params)                           # one-time layout prep (outside jit)

    y = transformer_decoder_forward(x, prepped)
    jax.block_until_ready(y)
    assert y.shape == (B, T, OUT) and y.dtype == jnp.float32
    assert bool(jnp.all(jnp.isfinite(y)))
    print("KERNEL_OK")
</pallas_src>

<mosaic_0001>
module attributes {stable_mosaic.version = 11 : i64} {
  func.func @fused_decoder_kernel(%arg0: memref<2x12x32xf32, #tpu.memory_space<vmem>>, %arg1: memref<16x32xf32, #tpu.memory_space<vmem>>, %arg2: memref<16x16xf32, #tpu.memory_space<vmem>>, %arg3: memref<20x32xf32, #tpu.memory_space<vmem>>, %arg4: memref<2x64xf32, #tpu.memory_space<vmem>>, %arg5: memref<160x32xf32, #tpu.memory_space<vmem>>, %arg6: memref<32x32xf32, #tpu.memory_space<vmem>>, %arg7: memref<2x2x32x16xf32, #tpu.memory_space<vmem>>, %arg8: memref<2x2x32x16xf32, #tpu.memory_space<vmem>>, %arg9: memref<2x2x32x16xf32, #tpu.memory_space<vmem>>, %arg10: memref<2x2x16x32xf32, #tpu.memory_space<vmem>>, %arg11: memref<2x32x64xf32, #tpu.memory_space<vmem>>, %arg12: memref<2x64x32xf32, #tpu.memory_space<vmem>>, %arg13: memref<32x128xf32, #tpu.memory_space<vmem>>, %arg14: memref<1x128xf32, #tpu.memory_space<vmem>>, %arg15: memref<16x128xf32, #tpu.memory_space<vmem>>) attributes {dimension_semantics = [], scalar_prefetch = 0 : i64, scratch_operands = 0 : i64, tpu.core_type = #tpu.core_type<tc>} {
    %c0 = arith.constant 0 : index
    %c0_0 = arith.constant 0 : index
    %c0_1 = arith.constant 0 : index
    %0 = vector.load %arg0[%c0, %c0_0, %c0_1] : memref<2x12x32xf32, #tpu.memory_space<vmem>>, vector<1x8x32xf32>
    %1 = vector.shape_cast %0 : vector<1x8x32xf32> to vector<8x32xf32>
    %c0_2 = arith.constant 0 : index
    %c1 = arith.constant 1 : index
    %c0_3 = arith.constant 0 : index
    %2 = vector.load %arg0[%c0_2, %c1, %c0_3] : memref<2x12x32xf32, #tpu.memory_space<vmem>>, vector<1x8x32xf32>
    %3 = vector.shape_cast %2 : vector<1x8x32xf32> to vector<8x32xf32>
    %c0_4 = arith.constant 0 : index
    %c2 = arith.constant 2 : index
    %c0_5 = arith.constant 0 : index
    %4 = vector.load %arg0[%c0_4, %c2, %c0_5] : memref<2x12x32xf32, #tpu.memory_space<vmem>>, vector<1x8x32xf32>
    %5 = vector.shape_cast %4 : vector<1x8x32xf32> to vector<8x32xf32>
    %c0_6 = arith.constant 0 : index
    %c3 = arith.constant 3 : index
    %c0_7 = arith.constant 0 : index
    %6 = vector.load %arg0[%c0_6, %c3, %c0_7] : memref<2x12x32xf32, #tpu.memory_space<vmem>>, vector<1x8x32xf32>
    %7 = vector.shape_cast %6 : vector<1x8x32xf32> to vector<8x32xf32>
    %c0_8 = arith.constant 0 : index
    %c4 = arith.constant 4 : index
    %c0_9 = arith.constant 0 : index
    %8 = vector.load %arg0[%c0_8, %c4, %c0_9] : memref<2x12x32xf32, #tpu.memory_space<vmem>>, vector<1x8x32xf32>
    %9 = vector.shape_cast %8 : vector<1x8x32xf32> to vector<8x32xf32>
    %10 = tpu.concatenate %1, %3, %5, %7, %9 in 1 : vector<8x32xf32>, vector<8x32xf32>, vector<8x32xf32>, vector<8x32xf32>, vector<8x32xf32> -> vector<8x160xf32>
    %c1_10 = arith.constant 1 : index
    %c0_11 = arith.constant 0 : index
    %c0_12 = arith.constant 0 : index
    %11 = vector.load %arg0[%c1_10, %c0_11, %c0_12] : memref<2x12x32xf32, #tpu.memory_space<vmem>>, vector<1x8x32xf32>
    %12 = vector.shape_cast %11 : vector<1x8x32xf32> to vector<8x32xf32>
    %c1_13 = arith.constant 1 : index
    %c1_14 = arith.constant 1 : index
    %c0_15 = arith.constant 0 : index
    %13 = vector.load %arg0[%c1_13, %c1_14, %c0_15] : memref<2x12x32xf32, #tpu.memory_space<vmem>>, vector<1x8x32xf32>
    %14 = vector.shape_cast %13 : vector<1x8x32xf32> to vector<8x32xf32>
    %c1_16 = arith.constant 1 : index
    %c2_17 = arith.constant 2 : index
    %c0_18 = arith.constant 0 : index
    %15 = vector.load %arg0[%c1_16, %c2_17, %c0_18] : memref<2x12x32xf32, #tpu.memory_space<vmem>>, vector<1x8x32xf32>
    %16 = vector.shape_cast %15 : vector<1x8x32xf32> to vector<8x32xf32>
    %c1_19 = arith.constant 1 : index
    %c3_20 = arith.constant 3 : index
    %c0_21 = arith.constant 0 : index
    %17 = vector.load %arg0[%c1_19, %c3_20, %c0_21] : memref<2x12x32xf32, #tpu.memory_space<vmem>>, vector<1x8x32xf32>
    %18 = vector.shape_cast %17 : vector<1x8x32xf32> to vector<8x32xf32>
    %c1_22 = arith.constant 1 : index
    %c4_23 = arith.constant 4 : index
    %c0_24 = arith.constant 0 : index
    %19 = vector.load %arg0[%c1_22, %c4_23, %c0_24] : memref<2x12x32xf32, #tpu.memory_space<vmem>>, vector<1x8x32xf32>
    %20 = vector.shape_cast %19 : vector<1x8x32xf32> to vector<8x32xf32>
    %21 = tpu.concatenate %12, %14, %16, %18, %20 in 1 : vector<8x32xf32>, vector<8x32xf32>, vector<8x32xf32>, vector<8x32xf32>, vector<8x32xf32> -> vector<8x160xf32>
    %22 = tpu.concatenate %10, %21 in 0 : vector<8x160xf32>, vector<8x160xf32> -> vector<16x160xf32>
    %c0_25 = arith.constant 0 : index
    %c0_26 = arith.constant 0 : index
    %23 = vector.load %arg5[%c0_25, %c0_26] : memref<160x32xf32, #tpu.memory_space<vmem>>, vector<160x32xf32>
    %cst = arith.constant dense<0.000000e+00> : vector<16x32xf32>
    %24 = tpu.matmul %22, %23, %cst {dimension_numbers = #tpu.dot_dimension_numbers<[1], [0], [0], [1], [0, 0, 1, 1], [], []>} : vector<16x160xf32>, vector<160x32xf32>, vector<16x32xf32> -> vector<16x32xf32>
    %c0_27 = arith.constant 0 : index
    %c0_28 = arith.constant 0 : index
    %25 = vector.load %arg3[%c0_27, %c0_28] : memref<20x32xf32, #tpu.memory_space<vmem>>, vector<1x32xf32>
    %26 = vector.broadcast %25 : vector<1x32xf32> to vector<16x32xf32>
    %27 = arith.addf %24, %26 : vector<16x32xf32>
    %cst_29 = arith.constant 2.000000e-01 : f32
    %28 = vector.broadcast %cst_29 : f32 to vector<16x32xf32>
    %29 = arith.mulf %28, %27 : vector<16x32xf32>
    %30 = arith.maximumf %27, %29 : vector<16x32xf32>
    %31 = vector.shape_cast %30 : vector<16x32xf32> to vector<2x8x32xf32>
    %cst_30 = arith.constant dense<0.000000e+00> : vector<2x32xf32>
    %32 = vector.multi_reduction <add>, %31, %cst_30 [1] : vector<2x8x32xf32> to vector<2x32xf32>
    %33 = vector.shape_cast %32 : vector<2x32xf32> to vector<2x1x32xf32>
    %cst_31 = arith.constant 8.000000e+00 : f32
    %34 = vector.broadcast %cst_31 : f32 to vector<2x1x32xf32>
    %35 = arith.divf %33, %34 : vector<2x1x32xf32>
    %36 = vector.broadcast %35 : vector<2x1x32xf32> to vector<2x8x32xf32>
    %37 = arith.subf %31, %36 : vector<2x8x32xf32>
    %38 = arith.mulf %37, %37 : vector<2x8x32xf32>
    %cst_32 = arith.constant dense<0.000000e+00> : vector<2x32xf32>
    %39 = vector.multi_reduction <add>, %38, %cst_32 [1] : vector<2x8x32xf32> to vector<2x32xf32>
    %40 = vector.shape_cast %39 : vector<2x32xf32> to vector<2x1x32xf32>
    %cst_33 = arith.constant 8.000000e+00 : f32
    %41 = vector.broadcast %cst_33 : f32 to vector<2x1x32xf32>
    %42 = arith.divf %40, %41 : vector<2x1x32xf32>
    %43 = vector.broadcast %35 : vector<2x1x32xf32> to vector<2x8x32xf32>
    %44 = arith.subf %31, %43 : vector<2x8x32xf32>
    %cst_34 = arith.constant 9.99999974E-6 : f32
    %45 = vector.broadcast %cst_34 : f32 to vector<2x1x32xf32>
    %46 = arith.addf %42, %45 : vector<2x1x32xf32>
    %47 = math.rsqrt %46 : vector<2x1x32xf32>
    %48 = vector.broadcast %47 : vector<2x1x32xf32> to vector<2x8x32xf32>
    %49 = arith.mulf %44, %48 : vector<2x8x32xf32>
    %50 = vector.shape_cast %49 : vector<2x8x32xf32> to vector<16x32xf32>
    %c0_35 = arith.constant 0 : index
    %c0_36 = arith.constant 0 : index
    %51 = vector.load %arg6[%c0_35, %c0_36] : memref<32x32xf32, #tpu.memory_space<vmem>>, vector<32x32xf32>
    %cst_37 = arith.constant dense<0.000000e+00> : vector<16x32xf32>
    %52 = tpu.matmul %50, %51, %cst_37 {dimension_numbers = #tpu.dot_dimension_numbers<[1], [0], [0], [1], [0, 0, 1, 1], [], []>} : vector<16x32xf32>, vector<32x32xf32>, vector<16x32xf32> -> vector<16x32xf32>
    %c1_38 = arith.constant 1 : index
    %c0_39 = arith.constant 0 : index
    %53 = vector.load %arg3[%c1_38, %c0_39] : memref<20x32xf32, #tpu.memory_space<vmem>>, vector<1x32xf32>
    %54 = vector.broadcast %53 : vector<1x32xf32> to vector<16x32xf32>
    %55 = arith.addf %52, %54 : vector<16x32xf32>
    %cst_40 = arith.constant 5.65685415 : f32
    %56 = vector.broadcast %cst_40 : f32 to vector<16x32xf32>
    %57 = arith.mulf %55, %56 : vector<16x32xf32>
    %c0_41 = arith.constant 0 : index
    %c0_42 = arith.constant 0 : index
    %58 = vector.load %arg1[%c0_41, %c0_42] : memref<16x32xf32, #tpu.memory_space<vmem>>, vector<16x32xf32>
    %59 = arith.addf %57, %58 : vector<16x32xf32>
    %c0_43 = arith.constant 0 : index
    %c0_44 = arith.constant 0 : index
    %60 = vector.load %arg2[%c0_43, %c0_44] : memref<16x16xf32, #tpu.memory_space<vmem>>, vector<16x16xf32>
    %c0_45 = arith.constant 0 : index
    %c0_46 = arith.constant 0 : index
    %c0_47 = arith.constant 0 : index
    %c0_48 = arith.constant 0 : index
    %61 = vector.load %arg7[%c0_45, %c0_46, %c0_47, %c0_48] : memref<2x2x32x16xf32, #tpu.memory_space<vmem>>, vector<1x1x32x16xf32>
    %62 = vector.shape_cast %61 : vector<1x1x32x16xf32> to vector<32x16xf32>
    %cst_49 = arith.constant dense<0.000000e+00> : vector<16x16xf32>
    %63 = tpu.matmul %59, %62, %cst_49 {dimension_numbers = #tpu.dot_dimension_numbers<[1], [0], [0], [1], [0, 0, 1, 1], [], []>} : vector<16x32xf32>, vector<32x16xf32>, vector<16x16xf32> -> vector<16x16xf32>
    %c2_50 = arith.constant 2 : index
    %c0_51 = arith.constant 0 : index
    %64 = vector.load %arg3[%c2_50, %c0_51] : memref<20x32xf32, #tpu.memory_space<vmem>>, vector<1x32xf32>
    %65 = vector.extract_strided_slice %64 {offsets = [0, 0], sizes = [1, 16], strides = [1, 1]} : vector<1x32xf32> to vector<1x16xf32>
    %66 = vector.broadcast %65 : vector<1x16xf32> to vector<16x16xf32>
    %67 = arith.addf %63, %66 : vector<16x16xf32>
    %c0_52 = arith.constant 0 : index
    %c0_53 = arith.constant 0 : index
    %c0_54 = arith.constant 0 : index
    %c0_55 = arith.constant 0 : index
    %68 = vector.load %arg8[%c0_52, %c0_53, %c0_54, %c0_55] : memref<2x2x32x16xf32, #tpu.memory_space<vmem>>, vector<1x1x32x16xf32>
    %69 = vector.shape_cast %68 : vector<1x1x32x16xf32> to vector<32x16xf32>
    %cst_56 = arith.constant dense<0.000000e+00> : vector<16x16xf32>
    %70 = tpu.matmul %59, %69, %cst_56 {dimension_numbers = #tpu.dot_dimension_numbers<[1], [0], [0], [1], [0, 0, 1, 1], [], []>} : vector<16x32xf32>, vector<32x16xf32>, vector<16x16xf32> -> vector<16x16xf32>
    %c3_57 = arith.constant 3 : index
    %c0_58 = arith.constant 0 : index
    %71 = vector.load %arg3[%c3_57, %c0_58] : memref<20x32xf32, #tpu.memory_space<vmem>>, vector<1x32xf32>
    %72 = vector.extract_strided_slice %71 {offsets = [0, 0], sizes = [1, 16], strides = [1, 1]} : vector<1x32xf32> to vector<1x16xf32>
    %73 = vector.broadcast %72 : vector<1x16xf32> to vector<16x16xf32>
    %74 = arith.addf %70, %73 : vector<16x16xf32>
    %c0_59 = arith.constant 0 : index
    %c0_60 = arith.constant 0 : index
    %c0_61 = arith.constant 0 : index
    %c0_62 = arith.constant 0 : index
    %75 = vector.load %arg9[%c0_59, %c0_60, %c0_61, %c0_62] : memref<2x2x32x16xf32, #tpu.memory_space<vmem>>, vector<1x1x32x16xf32>
    %76 = vector.shape_cast %75 : vector<1x1x32x16xf32> to vector<32x16xf32>
    %cst_63 = arith.constant dense<0.000000e+00> : vector<16x16xf32>
    %77 = tpu.matmul %59, %76, %cst_63 {dimension_numbers = #tpu.dot_dimension_numbers<[1], [0], [0], [1], [0, 0, 1, 1], [], []>} : vector<16x32xf32>, vector<32x16xf32>, vector<16x16xf32> -> vector<16x16xf32>
    %c4_64 = arith.constant 4 : index
    %c0_65 = arith.constant 0 : index
    %78 = vector.load %arg3[%c4_64, %c0_65] : memref<20x32xf32, #tpu.memory_space<vmem>>, vector<1x32xf32>
    %79 = vector.extract_strided_slice %78 {offsets = [0, 0], sizes = [1, 16], strides = [1, 1]} : vector<1x32xf32> to vector<1x16xf32>
    %80 = vector.broadcast %79 : vector<1x16xf32> to vector<16x16xf32>
    %81 = arith.addf %77, %80 : vector<16x16xf32>
    %cst_66 = arith.constant dense<0.000000e+00> : vector<16x16xf32>
    %82 = tpu.matmul %67, %74, %cst_66 {dimension_numbers = #tpu.dot_dimension_numbers<[1], [1], [0], [0], [0, 0, 1, 0], [], []>} : vector<16x16xf32>, vector<16x16xf32>, vector<16x16xf32> -> vector<16x16xf32>
    %cst_67 = arith.constant 2.500000e-01 : f32
    %83 = vector.broadcast %cst_67 : f32 to vector<16x16xf32>
    %84 = arith.mulf %82, %83 : vector<16x16xf32>
    %85 = arith.addf %84, %60 : vector<16x16xf32>
    %cst_68 = arith.constant dense<0xFF800000> : vector<16xf32>
    %86 = vector.multi_reduction <maximumf>, %85, %cst_68 [1] : vector<16x16xf32> to vector<16xf32>
    %87 = vector.shape_cast %86 : vector<16xf32> to vector<16x1xf32>
    %88 = vector.broadcast %87 : vector<16x1xf32> to vector<16x16xf32>
    %89 = arith.subf %85, %88 : vector<16x16xf32>
    %90 = math.exp %89 : vector<16x16xf32>
    %cst_69 = arith.constant dense<0.000000e+00> : vector<16xf32>
    %91 = vector.multi_reduction <add>, %90, %cst_69 [1] : vector<16x16xf32> to vector<16xf32>
    %92 = vector.shape_cast %91 : vector<16xf32> to vector<16x1xf32>
    %93 = tpu.reciprocal %92 {approx = true} : vector<16x1xf32> -> vector<16x1xf32>
    %94 = vector.broadcast %93 : vector<16x1xf32> to vector<16x16xf32>
    %95 = arith.mulf %90, %94 : vector<16x16xf32>
    %cst_70 = arith.constant dense<0.000000e+00> : vector<16x16xf32>
    %96 = tpu.matmul %95, %81, %cst_70 {dimension_numbers = #tpu.dot_dimension_numbers<[1], [0], [0], [1], [0, 0, 1, 1], [], []>} : vector<16x16xf32>, vector<16x16xf32>, vector<16x16xf32> -> vector<16x16xf32>
    %c0_71 = arith.constant 0 : index
    %c0_72 = arith.constant 0 : index
    %c0_73 = arith.constant 0 : index
    %c0_74 = arith.constant 0 : index
    %97 = vector.load %arg10[%c0_71, %c0_72, %c0_73, %c0_74] : memref<2x2x16x32xf32, #tpu.memory_space<vmem>>, vector<1x1x16x32xf32>
    %98 = vector.shape_cast %97 : vector<1x1x16x32xf32> to vector<16x32xf32>
    %cst_75 = arith.constant dense<0.000000e+00> : vector<16x32xf32>
    %99 = tpu.matmul %96, %98, %cst_75 {dimension_numbers = #tpu.dot_dimension_numbers<[1], [0], [0], [1], [0, 0, 1, 1], [], []>} : vector<16x16xf32>, vector<16x32xf32>, vector<16x32xf32> -> vector<16x32xf32>
    %c0_76 = arith.constant 0 : index
    %c1_77 = arith.constant 1 : index
    %c0_78 = arith.constant 0 : index
    %c0_79 = arith.constant 0 : index
    %100 = vector.load %arg7[%c0_76, %c1_77, %c0_78, %c0_79] : memref<2x2x32x16xf32, #tpu.memory_space<vmem>>, vector<1x1x32x16xf32>
    %101 = vector.shape_cast %100 : vector<1x1x32x16xf32> to vector<32x16xf32>
    %cst_80 = arith.constant dense<0.000000e+00> : vector<16x16xf32>
    %102 = tpu.matmul %59, %101, %cst_80 {dimension_numbers = #tpu.dot_dimension_numbers<[1], [0], [0], [1], [0, 0, 1, 1], [], []>} : vector<16x32xf32>, vector<32x16xf32>, vector<16x16xf32> -> vector<16x16xf32>
    %c2_81 = arith.constant 2 : index
    %c0_82 = arith.constant 0 : index
    %103 = vector.load %arg3[%c2_81, %c0_82] : memref<20x32xf32, #tpu.memory_space<vmem>>, vector<1x32xf32>
    %104 = vector.extract_strided_slice %103 {offsets = [0, 16], sizes = [1, 16], strides = [1, 1]} : vector<1x32xf32> to vector<1x16xf32>
    %105 = vector.broadcast %104 : vector<1x16xf32> to vector<16x16xf32>
    %106 = arith.addf %102, %105 : vector<16x16xf32>
    %c0_83 = arith.constant 0 : index
    %c1_84 = arith.constant 1 : index
    %c0_85 = arith.constant 0 : index
    %c0_86 = arith.constant 0 : index
    %107 = vector.load %arg8[%c0_83, %c1_84, %c0_85, %c0_86] : memref<2x2x32x16xf32, #tpu.memory_space<vmem>>, vector<1x1x32x16xf32>
    %108 = vector.shape_cast %107 : vector<1x1x32x16xf32> to vector<32x16xf32>
    %cst_87 = arith.constant dense<0.000000e+00> : vector<16x16xf32>
    %109 = tpu.matmul %59, %108, %cst_87 {dimension_numbers = #tpu.dot_dimension_numbers<[1], [0], [0], [1], [0, 0, 1, 1], [], []>} : vector<16x32xf32>, vector<32x16xf32>, vector<16x16xf32> -> vector<16x16xf32>
    %c3_88 = arith.constant 3 : index
    %c0_89 = arith.constant 0 : index
    %110 = vector.load %arg3[%c3_88, %c0_89] : memref<20x32xf32, #tpu.memory_space<vmem>>, vector<1x32xf32>
    %111 = vector.extract_strided_slice %110 {offsets = [0, 16], sizes = [1, 16], strides = [1, 1]} : vector<1x32xf32> to vector<1x16xf32>
    %112 = vector.broadcast %111 : vector<1x16xf32> to vector<16x16xf32>
    %113 = arith.addf %109, %112 : vector<16x16xf32>
    %c0_90 = arith.constant 0 : index
    %c1_91 = arith.constant 1 : index
    %c0_92 = arith.constant 0 : index
    %c0_93 = arith.constant 0 : index
    %114 = vector.load %arg9[%c0_90, %c1_91, %c0_92, %c0_93] : memref<2x2x32x16xf32, #tpu.memory_space<vmem>>, vector<1x1x32x16xf32>
    %115 = vector.shape_cast %114 : vector<1x1x32x16xf32> to vector<32x16xf32>
    %cst_94 = arith.constant dense<0.000000e+00> : vector<16x16xf32>
    %116 = tpu.matmul %59, %115, %cst_94 {dimension_numbers = #tpu.dot_dimension_numbers<[1], [0], [0], [1], [0, 0, 1, 1], [], []>} : vector<16x32xf32>, vector<32x16xf32>, vector<16x16xf32> -> vector<16x16xf32>
    %c4_95 = arith.constant 4 : index
    %c0_96 = arith.constant 0 : index
    %117 = vector.load %arg3[%c4_95, %c0_96] : memref<20x32xf32, #tpu.memory_space<vmem>>, vector<1x32xf32>
    %118 = vector.extract_strided_slice %117 {offsets = [0, 16], sizes = [1, 16], strides = [1, 1]} : vector<1x32xf32> to vector<1x16xf32>
    %119 = vector.broadcast %118 : vector<1x16xf32> to vector<16x16xf32>
    %120 = arith.addf %116, %119 : vector<16x16xf32>
    %cst_97 = arith.constant dense<0.000000e+00> : vector<16x16xf32>
    %121 = tpu.matmul %106, %113, %cst_97 {dimension_numbers = #tpu.dot_dimension_numbers<[1], [1], [0], [0], [0, 0, 1, 0], [], []>} : vector<16x16xf32>, vector<16x16xf32>, vector<16x16xf32> -> vector<16x16xf32>
    %cst_98 = arith.constant 2.500000e-01 : f32
    %122 = vector.broadcast %cst_98 : f32 to vector<16x16xf32>
    %123 = arith.mulf %121, %122 : vector<16x16xf32>
    %124 = arith.addf %123, %60 : vector<16x16xf32>
    %cst_99 = arith.constant dense<0xFF800000> : vector<16xf32>
    %125 = vector.multi_reduction <maximumf>, %124, %cst_99 [1] : vector<16x16xf32> to vector<16xf32>
    %126 = vector.shape_cast %125 : vector<16xf32> to vector<16x1xf32>
    %127 = vector.broadcast %126 : vector<16x1xf32> to vector<16x16xf32>
    %128 = arith.subf %124, %127 : vector<16x16xf32>
    %129 = math.exp %128 : vector<16x16xf32>
    %cst_100 = arith.constant dense<0.000000e+00> : vector<16xf32>
    %130 = vector.multi_reduction <add>, %129, %cst_100 [1] : vector<16x16xf32> to vector<16xf32>
    %131 = vector.shape_cast %130 : vector<16xf32> to vector<16x1xf32>
    %132 = tpu.reciprocal %131 {approx = true} : vector<16x1xf32> -> vector<16x1xf32>
    %133 = vector.broadcast %132 : vector<16x1xf32> to vector<16x16xf32>
    %134 = arith.mulf %129, %133 : vector<16x16xf32>
    %cst_101 = arith.constant dense<0.000000e+00> : vector<16x16xf32>
    %135 = tpu.matmul %134, %120, %cst_101 {dimension_numbers = #tpu.dot_dimension_numbers<[1], [0], [0], [1], [0, 0, 1, 1], [], []>} : vector<16x16xf32>, vector<16x16xf32>, vector<16x16xf32> -> vector<16x16xf32>
    %c0_102 = arith.constant 0 : index
    %c1_103 = arith.constant 1 : index
    %c0_104 = arith.constant 0 : index
    %c0_105 = arith.constant 0 : index
    %136 = vector.load %arg10[%c0_102, %c1_103, %c0_104, %c0_105] : memref<2x2x16x32xf32, #tpu.memory_space<vmem>>, vector<1x1x16x32xf32>
    %137 = vector.shape_cast %136 : vector<1x1x16x32xf32> to vector<16x32xf32>
    %cst_106 = arith.constant dense<0.000000e+00> : vector<16x32xf32>
    %138 = tpu.matmul %135, %137, %cst_106 {dimension_numbers = #tpu.dot_dimension_numbers<[1], [0], [0], [1], [0, 0, 1, 1], [], []>} : vector<16x16xf32>, vector<16x32xf32>, vector<16x32xf32> -> vector<16x32xf32>
    %139 = arith.addf %99, %138 : vector<16x32xf32>
    %c5 = arith.constant 5 : index
    %c0_107 = arith.constant 0 : index
    %140 = vector.load %arg3[%c5, %c0_107] : memref<20x32xf32, #tpu.memory_space<vmem>>, vector<1x32xf32>
    %141 = vector.broadcast %140 : vector<1x32xf32> to vector<16x32xf32>
    %142 = arith.addf %139, %141 : vector<16x32xf32>
    %143 = arith.addf %59, %142 : vector<16x32xf32>
    %cst_108 = arith.constant dense<0.000000e+00> : vector<16xf32>
    %144 = vector.multi_reduction <add>, %143, %cst_108 [1] : vector<16x32xf32> to vector<16xf32>
    %145 = vector.shape_cast %144 : vector<16xf32> to vector<16x1xf32>
    %cst_109 = arith.constant 3.200000e+01 : f32
    %146 = vector.broadcast %cst_109 : f32 to vector<16x1xf32>
    %147 = arith.divf %145, %146 : vector<16x1xf32>
    %148 = vector.broadcast %147 : vector<16x1xf32> to vector<16x32xf32>
    %149 = arith.subf %143, %148 : vector<16x32xf32>
    %150 = arith.mulf %149, %149 : vector<16x32xf32>
    %cst_110 = arith.constant dense<0.000000e+00> : vector<16xf32>
    %151 = vector.multi_reduction <add>, %150, %cst_110 [1] : vector<16x32xf32> to vector<16xf32>
    %152 = vector.shape_cast %151 : vector<16xf32> to vector<16x1xf32>
    %cst_111 = arith.constant 3.200000e+01 : f32
    %153 = vector.broadcast %cst_111 : f32 to vector<16x1xf32>
    %154 = arith.divf %152, %153 : vector<16x1xf32>
    %cst_112 = arith.constant 9.99999974E-6 : f32
    %155 = vector.broadcast %cst_112 : f32 to vector<16x1xf32>
    %156 = arith.addf %154, %155 : vector<16x1xf32>
    %157 = math.rsqrt %156 : vector<16x1xf32>
    %158 = vector.broadcast %157 : vector<16x1xf32> to vector<16x32xf32>
    %159 = arith.mulf %149, %158 : vector<16x32xf32>
    %c6 = arith.constant 6 : index
    %c0_113 = arith.constant 0 : index
    %160 = vector.load %arg3[%c6, %c0_113] : memref<20x32xf32, #tpu.memory_space<vmem>>, vector<1x32xf32>
    %161 = vector.broadcast %160 : vector<1x32xf32> to vector<16x32xf32>
    %162 = arith.mulf %159, %161 : vector<16x32xf32>
    %c7 = arith.constant 7 : index
    %c0_114 = arith.constant 0 : index
    %163 = vector.load %arg3[%c7, %c0_114] : memref<20x32xf32, #tpu.memory_space<vmem>>, vector<1x32xf32>
    %164 = vector.broadcast %163 : vector<1x32xf32> to vector<16x32xf32>
    %165 = arith.addf %162, %164 : vector<16x32xf32>
    %c0_115 = arith.constant 0 : index
    %c0_116 = arith.constant 0 : index
    %c0_117 = arith.constant 0 : index
    %166 = vector.load %arg11[%c0_115, %c0_116, %c0_117] : memref<2x32x64xf32, #tpu.memory_space<vmem>>, vector<1x32x64xf32>
    %167 = vector.shape_cast %166 : vector<1x32x64xf32> to vector<32x64xf32>
    %cst_118 = arith.constant dense<0.000000e+00> : vector<16x64xf32>
    %168 = tpu.matmul %165, %167, %cst_118 {dimension_numbers = #tpu.dot_dimension_numbers<[1], [0], [0], [1], [0, 0, 1, 1], [], []>} : vector<16x32xf32>, vector<32x64xf32>, vector<16x64xf32> -> vector<16x64xf32>
    %c0_119 = arith.constant 0 : index
    %c0_120 = arith.constant 0 : index
    %169 = vector.load %arg4[%c0_119, %c0_120] : memref<2x64xf32, #tpu.memory_space<vmem>>, vector<1x64xf32>
    %170 = vector.broadcast %169 : vector<1x64xf32> to vector<16x64xf32>
    %171 = arith.addf %168, %170 : vector<16x64xf32>
    %172 = arith.mulf %171, %171 : vector<16x64xf32>
    %173 = arith.mulf %171, %172 : vector<16x64xf32>
    %cst_121 = arith.constant 4.471500e-02 : f32
    %174 = vector.broadcast %cst_121 : f32 to vector<16x64xf32>
    %175 = arith.mulf %174, %173 : vector<16x64xf32>
    %176 = arith.addf %171, %175 : vector<16x64xf32>
    %cst_122 = arith.constant 0.797884583 : f32
    %177 = vector.broadcast %cst_122 : f32 to vector<16x64xf32>
    %178 = arith.mulf %177, %176 : vector<16x64xf32>
    %179 = math.tanh %178 : vector<16x64xf32>
    %cst_123 = arith.constant 1.000000e+00 : f32
    %180 = vector.broadcast %cst_123 : f32 to vector<16x64xf32>
    %181 = arith.addf %180, %179 : vector<16x64xf32>
    %cst_124 = arith.constant 5.000000e-01 : f32
    %182 = vector.broadcast %cst_124 : f32 to vector<16x64xf32>
    %183 = arith.mulf %182, %181 : vector<16x64xf32>
    %184 = arith.mulf %171, %183 : vector<16x64xf32>
    %c0_125 = arith.constant 0 : index
    %c0_126 = arith.constant 0 : index
    %c0_127 = arith.constant 0 : index
    %185 = vector.load %arg12[%c0_125, %c0_126, %c0_127] : memref<2x64x32xf32, #tpu.memory_space<vmem>>, vector<1x64x32xf32>
    %186 = vector.shape_cast %185 : vector<1x64x32xf32> to vector<64x32xf32>
    %cst_128 = arith.constant dense<0.000000e+00> : vector<16x32xf32>
    %187 = tpu.matmul %184, %186, %cst_128 {dimension_numbers = #tpu.dot_dimension_numbers<[1], [0], [0], [1], [0, 0, 1, 1], [], []>} : vector<16x64xf32>, vector<64x32xf32>, vector<16x32xf32> -> vector<16x32xf32>
    %c10 = arith.constant 10 : index
    %c0_129 = arith.constant 0 : index
    %188 = vector.load %arg3[%c10, %c0_129] : memref<20x32xf32, #tpu.memory_space<vmem>>, vector<1x32xf32>
    %189 = vector.broadcast %188 : vector<1x32xf32> to vector<16x32xf32>
    %190 = arith.addf %187, %189 : vector<16x32xf32>
    %191 = arith.addf %165, %190 : vector<16x32xf32>
    %cst_130 = arith.constant dense<0.000000e+00> : vector<16xf32>
    %192 = vector.multi_reduction <add>, %191, %cst_130 [1] : vector<16x32xf32> to vector<16xf32>
    %193 = vector.shape_cast %192 : vector<16xf32> to vector<16x1xf32>
    %cst_131 = arith.constant 3.200000e+01 : f32
    %194 = vector.broadcast %cst_131 : f32 to vector<16x1xf32>
    %195 = arith.divf %193, %194 : vector<16x1xf32>
    %196 = vector.broadcast %195 : vector<16x1xf32> to vector<16x32xf32>
    %197 = arith.subf %191, %196 : vector<16x32xf32>
    %198 = arith.mulf %197, %197 : vector<16x32xf32>
    %cst_132 = arith.constant dense<0.000000e+00> : vector<16xf32>
    %199 = vector.multi_reduction <add>, %198, %cst_132 [1] : vector<16x32xf32> to vector<16xf32>
    %200 = vector.shape_cast %199 : vector<16xf32> to vector<16x1xf32>
    %cst_133 = arith.constant 3.200000e+01 : f32
    %201 = vector.broadcast %cst_133 : f32 to vector<16x1xf32>
    %202 = arith.divf %200, %201 : vector<16x1xf32>
    %cst_134 = arith.constant 9.99999974E-6 : f32
    %203 = vector.broadcast %cst_134 : f32 to vector<16x1xf32>
    %204 = arith.addf %202, %203 : vector<16x1xf32>
    %205 = math.rsqrt %204 : vector<16x1xf32>
    %206 = vector.broadcast %205 : vector<16x1xf32> to vector<16x32xf32>
    %207 = arith.mulf %197, %206 : vector<16x32xf32>
    %c8 = arith.constant 8 : index
    %c0_135 = arith.constant 0 : index
    %208 = vector.load %arg3[%c8, %c0_135] : memref<20x32xf32, #tpu.memory_space<vmem>>, vector<1x32xf32>
    %209 = vector.broadcast %208 : vector<1x32xf32> to vector<16x32xf32>
    %210 = arith.mulf %207, %209 : vector<16x32xf32>
    %c9 = arith.constant 9 : index
    %c0_136 = arith.constant 0 : index
    %211 = vector.load %arg3[%c9, %c0_136] : memref<20x32xf32, #tpu.memory_space<vmem>>, vector<1x32xf32>
    %212 = vector.broadcast %211 : vector<1x32xf32> to vector<16x32xf32>
    %213 = arith.addf %210, %212 : vector<16x32xf32>
    %c1_137 = arith.constant 1 : index
    %c0_138 = arith.constant 0 : index
    %c0_139 = arith.constant 0 : index
    %c0_140 = arith.constant 0 : index
    %214 = vector.load %arg7[%c1_137, %c0_138, %c0_139, %c0_140] : memref<2x2x32x16xf32, #tpu.memory_space<vmem>>, vector<1x1x32x16xf32>
    %215 = vector.shape_cast %214 : vector<1x1x32x16xf32> to vector<32x16xf32>
    %cst_141 = arith.constant dense<0.000000e+00> : vector<16x16xf32>
    %216 = tpu.matmul %213, %215, %cst_141 {dimension_numbers = #tpu.dot_dimension_numbers<[1], [0], [0], [1], [0, 0, 1, 1], [], []>} : vector<16x32xf32>, vector<32x16xf32>, vector<16x16xf32> -> vector<16x16xf32>
    %c11 = arith.constant 11 : index
    %c0_142 = arith.constant 0 : index
    %217 = vector.load %arg3[%c11, %c0_142] : memref<20x32xf32, #tpu.memory_space<vmem>>, vector<1x32xf32>
    %218 = vector.extract_strided_slice %217 {offsets = [0, 0], sizes = [1, 16], strides = [1, 1]} : vector<1x32xf32> to vector<1x16xf32>
    %219 = vector.broadcast %218 : vector<1x16xf32> to vector<16x16xf32>
    %220 = arith.addf %216, %219 : vector<16x16xf32>
    %c1_143 = arith.constant 1 : index
    %c0_144 = arith.constant 0 : index
    %c0_145 = arith.constant 0 : index
    %c0_146 = arith.constant 0 : index
    %221 = vector.load %arg8[%c1_143, %c0_144, %c0_145, %c0_146] : memref<2x2x32x16xf32, #tpu.memory_space<vmem>>, vector<1x1x32x16xf32>
    %222 = vector.shape_cast %221 : vector<1x1x32x16xf32> to vector<32x16xf32>
    %cst_147 = arith.constant dense<0.000000e+00> : vector<16x16xf32>
    %223 = tpu.matmul %213, %222, %cst_147 {dimension_numbers = #tpu.dot_dimension_numbers<[1], [0], [0], [1], [0, 0, 1, 1], [], []>} : vector<16x32xf32>, vector<32x16xf32>, vector<16x16xf32> -> vector<16x16xf32>
    %c12 = arith.constant 12 : index
    %c0_148 = arith.constant 0 : index
    %224 = vector.load %arg3[%c12, %c0_148] : memref<20x32xf32, #tpu.memory_space<vmem>>, vector<1x32xf32>
    %225 = vector.extract_strided_slice %224 {offsets = [0, 0], sizes = [1, 16], strides = [1, 1]} : vector<1x32xf32> to vector<1x16xf32>
    %226 = vector.broadcast %225 : vector<1x16xf32> to vector<16x16xf32>
    %227 = arith.addf %223, %226 : vector<16x16xf32>
    %c1_149 = arith.constant 1 : index
    %c0_150 = arith.constant 0 : index
    %c0_151 = arith.constant 0 : index
    %c0_152 = arith.constant 0 : index
    %228 = vector.load %arg9[%c1_149, %c0_150, %c0_151, %c0_152] : memref<2x2x32x16xf32, #tpu.memory_space<vmem>>, vector<1x1x32x16xf32>
    %229 = vector.shape_cast %228 : vector<1x1x32x16xf32> to vector<32x16xf32>
    %cst_153 = arith.constant dense<0.000000e+00> : vector<16x16xf32>
    %230 = tpu.matmul %213, %229, %cst_153 {dimension_numbers = #tpu.dot_dimension_numbers<[1], [0], [0], [1], [0, 0, 1, 1], [], []>} : vector<16x32xf32>, vector<32x16xf32>, vector<16x16xf32> -> vector<16x16xf32>
    %c13 = arith.constant 13 : index
    %c0_154 = arith.constant 0 : index
    %231 = vector.load %arg3[%c13, %c0_154] : memref<20x32xf32, #tpu.memory_space<vmem>>, vector<1x32xf32>
    %232 = vector.extract_strided_slice %231 {offsets = [0, 0], sizes = [1, 16], strides = [1, 1]} : vector<1x32xf32> to vector<1x16xf32>
    %233 = vector.broadcast %232 : vector<1x16xf32> to vector<16x16xf32>
    %234 = arith.addf %230, %233 : vector<16x16xf32>
    %cst_155 = arith.constant dense<0.000000e+00> : vector<16x16xf32>
    %235 = tpu.matmul %220, %227, %cst_155 {dimension_numbers = #tpu.dot_dimension_numbers<[1], [1], [0], [0], [0, 0, 1, 0], [], []>} : vector<16x16xf32>, vector<16x16xf32>, vector<16x16xf32> -> vector<16x16xf32>
    %cst_156 = arith.constant 2.500000e-01 : f32
    %236 = vector.broadcast %cst_156 : f32 to vector<16x16xf32>
    %237 = arith.mulf %235, %236 : vector<16x16xf32>
    %238 = arith.addf %237, %60 : vector<16x16xf32>
    %cst_157 = arith.constant dense<0xFF800000> : vector<16xf32>
    %239 = vector.multi_reduction <maximumf>, %238, %cst_157 [1] : vector<16x16xf32> to vector<16xf32>
    %240 = vector.shape_cast %239 : vector<16xf32> to vector<16x1xf32>
    %241 = vector.broadcast %240 : vector<16x1xf32> to vector<16x16xf32>
    %242 = arith.subf %238, %241 : vector<16x16xf32>
    %243 = math.exp %242 : vector<16x16xf32>
    %cst_158 = arith.constant dense<0.000000e+00> : vector<16xf32>
    %244 = vector.multi_reduction <add>, %243, %cst_158 [1] : vector<16x16xf32> to vector<16xf32>
    %245 = vector.shape_cast %244 : vector<16xf32> to vector<16x1xf32>
    %246 = tpu.reciprocal %245 {approx = true} : vector<16x1xf32> -> vector<16x1xf32>
    %247 = vector.broadcast %246 : vector<16x1xf32> to vector<16x16xf32>
    %248 = arith.mulf %243, %247 : vector<16x16xf32>
    %cst_159 = arith.constant dense<0.000000e+00> : vector<16x16xf32>
    %249 = tpu.matmul %248, %234, %cst_159 {dimension_numbers = #tpu.dot_dimension_numbers<[1], [0], [0], [1], [0, 0, 1, 1], [], []>} : vector<16x16xf32>, vector<16x16xf32>, vector<16x16xf32> -> vector<16x16xf32>
    %c1_160 = arith.constant 1 : index
    %c0_161 = arith.constant 0 : index
    %c0_162 = arith.constant 0 : index
    %c0_163 = arith.constant 0 : index
    %250 = vector.load %arg10[%c1_160, %c0_161, %c0_162, %c0_163] : memref<2x2x16x32xf32, #tpu.memory_space<vmem>>, vector<1x1x16x32xf32>
    %251 = vector.shape_cast %250 : vector<1x1x16x32xf32> to vector<16x32xf32>
    %cst_164 = arith.constant dense<0.000000e+00> : vector<16x32xf32>
    %252 = tpu.matmul %249, %251, %cst_164 {dimension_numbers = #tpu.dot_dimension_numbers<[1], [0], [0], [1], [0, 0, 1, 1], [], []>} : vector<16x16xf32>, vector<16x32xf32>, vector<16x32xf32> -> vector<16x32xf32>
    %c1_165 = arith.constant 1 : index
    %c1_166 = arith.constant 1 : index
    %c0_167 = arith.constant 0 : index
    %c0_168 = arith.constant 0 : index
    %253 = vector.load %arg7[%c1_165, %c1_166, %c0_167, %c0_168] : memref<2x2x32x16xf32, #tpu.memory_space<vmem>>, vector<1x1x32x16xf32>
    %254 = vector.shape_cast %253 : vector<1x1x32x16xf32> to vector<32x16xf32>
    %cst_169 = arith.constant dense<0.000000e+00> : vector<16x16xf32>
    %255 = tpu.matmul %213, %254, %cst_169 {dimension_numbers = #tpu.dot_dimension_numbers<[1], [0], [0], [1], [0, 0, 1, 1], [], []>} : vector<16x32xf32>, vector<32x16xf32>, vector<16x16xf32> -> vector<16x16xf32>
    %c11_170 = arith.constant 11 : index
    %c0_171 = arith.constant 0 : index
    %256 = vector.load %arg3[%c11_170, %c0_171] : memref<20x32xf32, #tpu.memory_space<vmem>>, vector<1x32xf32>
    %257 = vector.extract_strided_slice %256 {offsets = [0, 16], sizes = [1, 16], strides = [1, 1]} : vector<1x32xf32> to vector<1x16xf32>
    %258 = vector.broadcast %257 : vector<1x16xf32> to vector<16x16xf32>
    %259 = arith.addf %255, %258 : vector<16x16xf32>
    %c1_172 = arith.constant 1 : index
    %c1_173 = arith.constant 1 : index
    %c0_174 = arith.constant 0 : index
    %c0_175 = arith.constant 0 : index
    %260 = vector.load %arg8[%c1_172, %c1_173, %c0_174, %c0_175] : memref<2x2x32x16xf32, #tpu.memory_space<vmem>>, vector<1x1x32x16xf32>
    %261 = vector.shape_cast %260 : vector<1x1x32x16xf32> to vector<32x16xf32>
    %cst_176 = arith.constant dense<0.000000e+00> : vector<16x16xf32>
    %262 = tpu.matmul %213, %261, %cst_176 {dimension_numbers = #tpu.dot_dimension_numbers<[1], [0], [0], [1], [0, 0, 1, 1], [], []>} : vector<16x32xf32>, vector<32x16xf32>, vector<16x16xf32> -> vector<16x16xf32>
    %c12_177 = arith.constant 12 : index
    %c0_178 = arith.constant 0 : index
    %263 = vector.load %arg3[%c12_177, %c0_178] : memref<20x32xf32, #tpu.memory_space<vmem>>, vector<1x32xf32>
    %264 = vector.extract_strided_slice %263 {offsets = [0, 16], sizes = [1, 16], strides = [1, 1]} : vector<1x32xf32> to vector<1x16xf32>
    %265 = vector.broadcast %264 : vector<1x16xf32> to vector<16x16xf32>
    %266 = arith.addf %262, %265 : vector<16x16xf32>
    %c1_179 = arith.constant 1 : index
    %c1_180 = arith.constant 1 : index
    %c0_181 = arith.constant 0 : index
    %c0_182 = arith.constant 0 : index
    %267 = vector.load %arg9[%c1_179, %c1_180, %c0_181, %c0_182] : memref<2x2x32x16xf32, #tpu.memory_space<vmem>>, vector<1x1x32x16xf32>
    %268 = vector.shape_cast %267 : vector<1x1x32x16xf32> to vector<32x16xf32>
    %cst_183 = arith.constant dense<0.000000e+00> : vector<16x16xf32>
    %269 = tpu.matmul %213, %268, %cst_183 {dimension_numbers = #tpu.dot_dimension_numbers<[1], [0], [0], [1], [0, 0, 1, 1], [], []>} : vector<16x32xf32>, vector<32x16xf32>, vector<16x16xf32> -> vector<16x16xf32>
    %c13_184 = arith.constant 13 : index
    %c0_185 = arith.constant 0 : index
    %270 = vector.load %arg3[%c13_184, %c0_185] : memref<20x32xf32, #tpu.memory_space<vmem>>, vector<1x32xf32>
    %271 = vector.extract_strided_slice %270 {offsets = [0, 16], sizes = [1, 16], strides = [1, 1]} : vector<1x32xf32> to vector<1x16xf32>
    %272 = vector.broadcast %271 : vector<1x16xf32> to vector<16x16xf32>
    %273 = arith.addf %269, %272 : vector<16x16xf32>
    %cst_186 = arith.constant dense<0.000000e+00> : vector<16x16xf32>
    %274 = tpu.matmul %259, %266, %cst_186 {dimension_numbers = #tpu.dot_dimension_numbers<[1], [1], [0], [0], [0, 0, 1, 0], [], []>} : vector<16x16xf32>, vector<16x16xf32>, vector<16x16xf32> -> vector<16x16xf32>
    %cst_187 = arith.constant 2.500000e-01 : f32
    %275 = vector.broadcast %cst_187 : f32 to vector<16x16xf32>
    %276 = arith.mulf %274, %275 : vector<16x16xf32>
    %277 = arith.addf %276, %60 : vector<16x16xf32>
    %cst_188 = arith.constant dense<0xFF800000> : vector<16xf32>
    %278 = vector.multi_reduction <maximumf>, %277, %cst_188 [1] : vector<16x16xf32> to vector<16xf32>
    %279 = vector.shape_cast %278 : vector<16xf32> to vector<16x1xf32>
    %280 = vector.broadcast %279 : vector<16x1xf32> to vector<16x16xf32>
    %281 = arith.subf %277, %280 : vector<16x16xf32>
    %282 = math.exp %281 : vector<16x16xf32>
    %cst_189 = arith.constant dense<0.000000e+00> : vector<16xf32>
    %283 = vector.multi_reduction <add>, %282, %cst_189 [1] : vector<16x16xf32> to vector<16xf32>
    %284 = vector.shape_cast %283 : vector<16xf32> to vector<16x1xf32>
    %285 = tpu.reciprocal %284 {approx = true} : vector<16x1xf32> -> vector<16x1xf32>
    %286 = vector.broadcast %285 : vector<16x1xf32> to vector<16x16xf32>
    %287 = arith.mulf %282, %286 : vector<16x16xf32>
    %cst_190 = arith.constant dense<0.000000e+00> : vector<16x16xf32>
    %288 = tpu.matmul %287, %273, %cst_190 {dimension_numbers = #tpu.dot_dimension_numbers<[1], [0], [0], [1], [0, 0, 1, 1], [], []>} : vector<16x16xf32>, vector<16x16xf32>, vector<16x16xf32> -> vector<16x16xf32>
    %c1_191 = arith.constant 1 : index
    %c1_192 = arith.constant 1 : index
    %c0_193 = arith.constant 0 : index
    %c0_194 = arith.constant 0 : index
    %289 = vector.load %arg10[%c1_191, %c1_192, %c0_193, %c0_194] : memref<2x2x16x32xf32, #tpu.memory_space<vmem>>, vector<1x1x16x32xf32>
    %290 = vector.shape_cast %289 : vector<1x1x16x32xf32> to vector<16x32xf32>
    %cst_195 = arith.constant dense<0.000000e+00> : vector<16x32xf32>
    %291 = tpu.matmul %288, %290, %cst_195 {dimension_numbers = #tpu.dot_dimension_numbers<[1], [0], [0], [1], [0, 0, 1, 1], [], []>} : vector<16x16xf32>, vector<16x32xf32>, vector<16x32xf32> -> vector<16x32xf32>
    %292 = arith.addf %252, %291 : vector<16x32xf32>
    %c14 = arith.constant 14 : index
    %c0_196 = arith.constant 0 : index
    %293 = vector.load %arg3[%c14, %c0_196] : memref<20x32xf32, #tpu.memory_space<vmem>>, vector<1x32xf32>
    %294 = vector.broadcast %293 : vector<1x32xf32> to vector<16x32xf32>
    %295 = arith.addf %292, %294 : vector<16x32xf32>
    %296 = arith.addf %213, %295 : vector<16x32xf32>
    %cst_197 = arith.constant dense<0.000000e+00> : vector<16xf32>
    %297 = vector.multi_reduction <add>, %296, %cst_197 [1] : vector<16x32xf32> to vector<16xf32>
    %298 = vector.shape_cast %297 : vector<16xf32> to vector<16x1xf32>
    %cst_198 = arith.constant 3.200000e+01 : f32
    %299 = vector.broadcast %cst_198 : f32 to vector<16x1xf32>
    %300 = arith.divf %298, %299 : vector<16x1xf32>
    %301 = vector.broadcast %300 : vector<16x1xf32> to vector<16x32xf32>
    %302 = arith.subf %296, %301 : vector<16x32xf32>
    %303 = arith.mulf %302, %302 : vector<16x32xf32>
    %cst_199 = arith.constant dense<0.000000e+00> : vector<16xf32>
    %304 = vector.multi_reduction <add>, %303, %cst_199 [1] : vector<16x32xf32> to vector<16xf32>
    %305 = vector.shape_cast %304 : vector<16xf32> to vector<16x1xf32>
    %cst_200 = arith.constant 3.200000e+01 : f32
    %306 = vector.broadcast %cst_200 : f32 to vector<16x1xf32>
    %307 = arith.divf %305, %306 : vector<16x1xf32>
    %cst_201 = arith.constant 9.99999974E-6 : f32
    %308 = vector.broadcast %cst_201 : f32 to vector<16x1xf32>
    %309 = arith.addf %307, %308 : vector<16x1xf32>
    %310 = math.rsqrt %309 : vector<16x1xf32>
    %311 = vector.broadcast %310 : vector<16x1xf32> to vector<16x32xf32>
    %312 = arith.mulf %302, %311 : vector<16x32xf32>
    %c15 = arith.constant 15 : index
    %c0_202 = arith.constant 0 : index
    %313 = vector.load %arg3[%c15, %c0_202] : memref<20x32xf32, #tpu.memory_space<vmem>>, vector<1x32xf32>
    %314 = vector.broadcast %313 : vector<1x32xf32> to vector<16x32xf32>
    %315 = arith.mulf %312, %314 : vector<16x32xf32>
    %c16 = arith.constant 16 : index
    %c0_203 = arith.constant 0 : index
    %316 = vector.load %arg3[%c16, %c0_203] : memref<20x32xf32, #tpu.memory_space<vmem>>, vector<1x32xf32>
    %317 = vector.broadcast %316 : vector<1x32xf32> to vector<16x32xf32>
    %318 = arith.addf %315, %317 : vector<16x32xf32>
    %c1_204 = arith.constant 1 : index
    %c0_205 = arith.constant 0 : index
    %c0_206 = arith.constant 0 : index
    %319 = vector.load %arg11[%c1_204, %c0_205, %c0_206] : memref<2x32x64xf32, #tpu.memory_space<vmem>>, vector<1x32x64xf32>
    %320 = vector.shape_cast %319 : vector<1x32x64xf32> to vector<32x64xf32>
    %cst_207 = arith.constant dense<0.000000e+00> : vector<16x64xf32>
    %321 = tpu.matmul %318, %320, %cst_207 {dimension_numbers = #tpu.dot_dimension_numbers<[1], [0], [0], [1], [0, 0, 1, 1], [], []>} : vector<16x32xf32>, vector<32x64xf32>, vector<16x64xf32> -> vector<16x64xf32>
    %c1_208 = arith.constant 1 : index
    %c0_209 = arith.constant 0 : index
    %322 = vector.load %arg4[%c1_208, %c0_209] : memref<2x64xf32, #tpu.memory_space<vmem>>, vector<1x64xf32>
    %323 = vector.broadcast %322 : vector<1x64xf32> to vector<16x64xf32>
    %324 = arith.addf %321, %323 : vector<16x64xf32>
    %325 = arith.mulf %324, %324 : vector<16x64xf32>
    %326 = arith.mulf %324, %325 : vector<16x64xf32>
    %cst_210 = arith.constant 4.471500e-02 : f32
    %327 = vector.broadcast %cst_210 : f32 to vector<16x64xf32>
    %328 = arith.mulf %327, %326 : vector<16x64xf32>
    %329 = arith.addf %324, %328 : vector<16x64xf32>
    %cst_211 = arith.constant 0.797884583 : f32
    %330 = vector.broadcast %cst_211 : f32 to vector<16x64xf32>
    %331 = arith.mulf %330, %329 : vector<16x64xf32>
    %332 = math.tanh %331 : vector<16x64xf32>
    %cst_212 = arith.constant 1.000000e+00 : f32
    %333 = vector.broadcast %cst_212 : f32 to vector<16x64xf32>
    %334 = arith.addf %333, %332 : vector<16x64xf32>
    %cst_213 = arith.constant 5.000000e-01 : f32
    %335 = vector.broadcast %cst_213 : f32 to vector<16x64xf32>
    %336 = arith.mulf %335, %334 : vector<16x64xf32>
    %337 = arith.mulf %324, %336 : vector<16x64xf32>
    %c1_214 = arith.constant 1 : index
    %c0_215 = arith.constant 0 : index
    %c0_216 = arith.constant 0 : index
    %338 = vector.load %arg12[%c1_214, %c0_215, %c0_216] : memref<2x64x32xf32, #tpu.memory_space<vmem>>, vector<1x64x32xf32>
    %339 = vector.shape_cast %338 : vector<1x64x32xf32> to vector<64x32xf32>
    %cst_217 = arith.constant dense<0.000000e+00> : vector<16x32xf32>
    %340 = tpu.matmul %337, %339, %cst_217 {dimension_numbers = #tpu.dot_dimension_numbers<[1], [0], [0], [1], [0, 0, 1, 1], [], []>} : vector<16x64xf32>, vector<64x32xf32>, vector<16x32xf32> -> vector<16x32xf32>
    %c19 = arith.constant 19 : index
    %c0_218 = arith.constant 0 : index
    %341 = vector.load %arg3[%c19, %c0_218] : memref<20x32xf32, #tpu.memory_space<vmem>>, vector<1x32xf32>
    %342 = vector.broadcast %341 : vector<1x32xf32> to vector<16x32xf32>
    %343 = arith.addf %340, %342 : vector<16x32xf32>
    %344 = arith.addf %318, %343 : vector<16x32xf32>
    %cst_219 = arith.constant dense<0.000000e+00> : vector<16xf32>
    %345 = vector.multi_reduction <add>, %344, %cst_219 [1] : vector<16x32xf32> to vector<16xf32>
    %346 = vector.shape_cast %345 : vector<16xf32> to vector<16x1xf32>
    %cst_220 = arith.constant 3.200000e+01 : f32
    %347 = vector.broadcast %cst_220 : f32 to vector<16x1xf32>
    %348 = arith.divf %346, %347 : vector<16x1xf32>
    %349 = vector.broadcast %348 : vector<16x1xf32> to vector<16x32xf32>
    %350 = arith.subf %344, %349 : vector<16x32xf32>
    %351 = arith.mulf %350, %350 : vector<16x32xf32>
    %cst_221 = arith.constant dense<0.000000e+00> : vector<16xf32>
    %352 = vector.multi_reduction <add>, %351, %cst_221 [1] : vector<16x32xf32> to vector<16xf32>
    %353 = vector.shape_cast %352 : vector<16xf32> to vector<16x1xf32>
    %cst_222 = arith.constant 3.200000e+01 : f32
    %354 = vector.broadcast %cst_222 : f32 to vector<16x1xf32>
    %355 = arith.divf %353, %354 : vector<16x1xf32>
    %cst_223 = arith.constant 9.99999974E-6 : f32
    %356 = vector.broadcast %cst_223 : f32 to vector<16x1xf32>
    %357 = arith.addf %355, %356 : vector<16x1xf32>
    %358 = math.rsqrt %357 : vector<16x1xf32>
    %359 = vector.broadcast %358 : vector<16x1xf32> to vector<16x32xf32>
    %360 = arith.mulf %350, %359 : vector<16x32xf32>
    %c17 = arith.constant 17 : index
    %c0_224 = arith.constant 0 : index
    %361 = vector.load %arg3[%c17, %c0_224] : memref<20x32xf32, #tpu.memory_space<vmem>>, vector<1x32xf32>
    %362 = vector.broadcast %361 : vector<1x32xf32> to vector<16x32xf32>
    %363 = arith.mulf %360, %362 : vector<16x32xf32>
    %c18 = arith.constant 18 : index
    %c0_225 = arith.constant 0 : index
    %364 = vector.load %arg3[%c18, %c0_225] : memref<20x32xf32, #tpu.memory_space<vmem>>, vector<1x32xf32>
    %365 = vector.broadcast %364 : vector<1x32xf32> to vector<16x32xf32>
    %366 = arith.addf %363, %365 : vector<16x32xf32>
    %c0_226 = arith.constant 0 : index
    %c0_227 = arith.constant 0 : index
    %367 = vector.load %arg13[%c0_226, %c0_227] : memref<32x128xf32, #tpu.memory_space<vmem>>, vector<32x128xf32>
    %cst_228 = arith.constant dense<0.000000e+00> : vector<16x128xf32>
    %368 = tpu.matmul %366, %367, %cst_228 {dimension_numbers = #tpu.dot_dimension_numbers<[1], [0], [0], [1], [0, 0, 1, 1], [], []>} : vector<16x32xf32>, vector<32x128xf32>, vector<16x128xf32> -> vector<16x128xf32>
    %c0_229 = arith.constant 0 : index
    %c0_230 = arith.constant 0 : index
    %369 = vector.load %arg14[%c0_229, %c0_230] : memref<1x128xf32, #tpu.memory_space<vmem>>, vector<1x128xf32>
    %370 = vector.broadcast %369 : vector<1x128xf32> to vector<16x128xf32>
    %371 = arith.addf %368, %370 : vector<16x128xf32>
    %c0_231 = arith.constant 0 : index
    %c0_232 = arith.constant 0 : index
    %372 = vector.load %arg15[%c0_231, %c0_232] : memref<16x128xf32, #tpu.memory_space<vmem>>, vector<16x128xf32>
    tpu.vector_store %arg15[%c0_231, %c0_232], %371 {strides = array<i32>} : memref<16x128xf32, #tpu.memory_space<vmem>>, vector<16x128xf32>,
    return
  }
}

</mosaic_0001>

<bundles_post_ra>
// kernel: transformer_decoder_forward.1
= control target key start
LH: loop header
LB: loop body
LE: loop exit
PB: predicated region body
PF: predicated region fallthrough
CT: control target
= control target key end

     0   :  { %v4096_v2 = vmov 0.0|0.0   ;;  %s4097_s22 = smov 32   ;;  %s4098_s23 = smov 96   ;;  %vm67_vm0 = vcmask 261120   ;;  %vm69_vm1 = vcmask 523264   ;;  %vm71_vm2 = vcmask 785408   ;;  %s4850_s0 = inlined_call_operand.vmem [shape: f32[2,12,32], index: 0, kind: input, shape index: {}]   ;;  %s4851_s5 = inlined_call_operand.vmem [shape: f32[160,32], index: 5, kind: input, shape index: {}]   ;;  %s4852_s6 = inlined_call_operand.vmem [shape: f32[32,32], index: 6, kind: input, shape index: {}]   ;;  %s4853_s3 = inlined_call_operand.vmem [shape: f32[20,32], index: 3, kind: input, shape index: {}]   ;;  %s4854_s7 = inlined_call_operand.vmem [shape: f32[2,2,32,16], index: 7, kind: input, shape index: {}]   ;;  %s4855_s8 = inlined_call_operand.vmem [shape: f32[2,2,32,16], index: 8, kind: input, shape index: {}]   ;;  %s4856_s9 = inlined_call_operand.vmem [shape: f32[2,2,32,16], index: 9, kind: input, shape index: {}]   ;;  %s4857_s1 = inlined_call_operand.vmem [shape: f32[16,32], index: 1, kind: input, shape index: {}]   ;;  %s4858_s2 = inlined_call_operand.vmem [shape: f32[16,16], index: 2, kind: input, shape index: {}]   ;;  %s4859_s10 = inlined_call_operand.vmem [shape: f32[2,2,16,32], index: 10, kind: input, shape index: {}]   ;;  %s4860_s11 = inlined_call_operand.vmem [shape: f32[2,32,64], index: 11, kind: input, shape index: {}]   ;;  %s4861_s12 = inlined_call_operand.vmem [shape: f32[2,64,32], index: 12, kind: input, shape index: {}]   ;;  %s4862_s4 = inlined_call_operand.vmem [shape: f32[2,64], index: 4, kind: input, shape index: {}]   ;;  %s4863_s13 = inlined_call_operand.vmem [shape: f32[32,128], index: 13, kind: input, shape index: {}]   ;;  %s4864_s14 = inlined_call_operand.vmem [shape: f32[1,128], index: 14, kind: input, shape index: {}]   ;;  %s4865_s15 = inlined_call_operand.vmem [shape: f32[16,128], index: 15, kind: output, shape index: {}]  }
   0x1   :  { %v51_v0 = vld [vmem:[%s4850_s0 + $0x1] sm:$0xff]  ;;  %3781 = vmatprep.subr.bf16.mxu0 %v4096_v2  ;;  %v3168_v4 = vld [vmem:[%s4850_s0 + $0x11] sm:$0xff]  ;;  %s4099_s21 = smov 64   ;;  %v3172_v59 = vld [vmem:[%s4853_s3] ss:$0 sm:$0xff]  ;;  %vm603_vm3 = vcmask 130048  }
   0x2   :  { %v53_v1 = vld [vmem:[%s4850_s0 + $0x3] sm:$0xff]  ;;  %56 = vrot.lane.b32.xlu0 %v51_v0, %s4097_s22  ;;  %v96_v8 = vld [vmem:[%s4851_s5 + $0x10] sm:$0xff]  ;;  %v97_v9 = vld [vmem:[%s4851_s5 + $0x18] sm:$0xff]  ;;  %s4100_s16 = smov 112  }
   0x3   :  { %64 = vrot.lane.b32.xlu1 %v53_v1, %s4098_s23  ;;  %v52_v3 = vld [vmem:[%s4850_s0 + $0x2] sm:$0xff]  ;;  %v3169_v10 = vld [vmem:[%s4850_s0 + $0x12] sm:$0xff]  ;;  %v3785_v12 = vpack.c.bf16 %v97_v9, %v96_v8  ;;  %vm4418_vm4 = vmpackc.low %vm603_vm3, %vm603_vm3 }
   0x4   :  { %v94_v5 = vld [vmem:[%s4851_s5] sm:$0xff]  ;;  %v95_v6 = vld [vmem:[%s4851_s5 + $0x8] sm:$0xff]  ;;  %v3170_v11 = vld [vmem:[%s4850_s0 + $0x13] sm:$0xff] }
   0x5   :  { %v3782_v7 = vpack.c.bf16 %v95_v6, %v94_v5  ;;  %v98_v13 = vld [vmem:[%s4851_s5 + $0x20] sm:$0xff]  ;;  %v99_v14 = vld [vmem:[%s4851_s5 + $0x28] sm:$0xff]  ;;  %v100_v17 = vld [vmem:[%s4851_s5 + $0x30] sm:$0xff] }
   0x6   :  { %60 = vrot.lane.b32.xlu0 %v52_v3, %s4099_s21  ;;  %v3788_v15 = vpack.c.bf16 %v99_v14, %v98_v13  ;;  %v54_v16 = vld [vmem:[%s4850_s0 + $0x4] sm:$0xff]  ;;  %v101_v18 = vld [vmem:[%s4851_s5 + $0x38] sm:$0xff]  ;;  %v104_v23 = vld [vmem:[%s4851_s5 + $0x50] sm:$0xff] }
   0x7   :  { %80 = vrot.lane.b32.xlu1 %v3168_v4, %s4097_s22  ;;  %3783 = vmatpush1.bf16.msra.mxu0 %v3782_v7  ;;  %v3791_v19 = vpack.c.bf16 %v101_v18, %v100_v17  ;;  %v102_v20 = vld [vmem:[%s4851_s5 + $0x40] sm:$0xff]  ;;  %v103_v21 = vld [vmem:[%s4851_s5 + $0x48] sm:$0xff]  ;;  %v105_v24 = vld [vmem:[%s4851_s5 + $0x58] sm:$0xff] }
   0x8   :  { %3784 = vmatprep.subr.bf16.mxu0 %v4096_v2  ;;  %3173 = vmatprep.mubr.msk.f32.mxu0 %vm67_vm0, %v54_v16  ;;  %v3794_v22 = vpack.c.bf16 %v103_v21, %v102_v20  ;;  %v3797_v25 = vpack.c.bf16 %v105_v24, %v104_v23  ;;  %v106_v26 = vld [vmem:[%s4851_s5 + $0x60] sm:$0xff]  ;;  %v107_v27 = vld [vmem:[%s4851_s5 + $0x68] sm:$0xff]  ;;  %v108_v29 = vld [vmem:[%s4851_s5 + $0x70] sm:$0xff] }
   0x9   :  { %v3800_v28 = vpack.c.bf16 %v107_v27, %v106_v26  ;;  %v109_v30 = vld [vmem:[%s4851_s5 + $0x78] sm:$0xff]  ;;  %v110_v32 = vld [vmem:[%s4851_s5 + $0x80] sm:$0xff]  ;;  %v111_v33 = vld [vmem:[%s4851_s5 + $0x88] sm:$0xff] }
   0xa   :  { %84 = vrot.lane.b32.xlu0 %v3169_v10, %s4099_s21  ;;  %v3803_v31 = vpack.c.bf16 %v109_v30, %v108_v29  ;;  %v3806_v34 = vpack.c.bf16 %v111_v33, %v110_v32  ;;  %v112_v35 = vld [vmem:[%s4851_s5 + $0x90] sm:$0xff]  ;;  %v113_v36 = vld [vmem:[%s4851_s5 + $0x98] sm:$0xff]  ;;  %v50_v40 = vld [vmem:[%s4850_s0] sm:$0xff] }
   0xb   :  { %88 = vrot.lane.b32.xlu1 %v3170_v11, %s4098_s23  ;;  %3786 = vmatpush1.bf16.msra.mxu0 %v3785_v12  ;;  %v3809_v37 = vpack.c.bf16 %v113_v36, %v112_v35  ;;  %v3167_v45 = vld [vmem:[%s4850_s0 + $0x10] sm:$0xff]  ;;  %v247_v53 = vld [vmem:[%s4852_s6] sm:$0xff]  ;;  %v248_v54 = vld [vmem:[%s4852_s6 + $0x8] sm:$0xff] }
   0xc   :  { %3787 = vmatprep.subr.bf16.mxu0 %v4096_v2  ;;  %v3171_v46 = vld [vmem:[%s4850_s0 + $0x14] sm:$0xff]  ;;  %v3811_v55 = vpack.c.bf16 %v248_v54, %v247_v53 }
   0xd   :  { %v249_v56 = vld [vmem:[%s4852_s6 + $0x10] sm:$0xff]  ;;  %v250_v57 = vld [vmem:[%s4852_s6 + $0x18] sm:$0xff] }
   0xe   :  { %3812 = vmatprep.subr.bf16.mxu1 %v3811_v55  ;;  %v3815_v58 = vpack.c.bf16 %v250_v57, %v249_v56  ;;  %v347_v54 = vld [vmem:[%s4854_s7 + $0x10] sm:$0xff] }
   0xf   :  { %3789 = vmatpush1.bf16.msra.mxu0 %v3788_v15  ;;  %3814 = vmatpush3.bf16.msra.mxu1 %v3811_v55  ;;  %v348_v55 = vld [vmem:[%s4854_s7 + $0x18] sm:$0xff]  ;;  %v3195_v56 = vld [vmem:[%s4854_s7 + $0x30] sm:$0xff] }
  0x10   :  { %3790 = vmatprep.subr.bf16.mxu0 %v4096_v2  ;;  %3816 = vmatprep.subr.bf16.mxu1 %v3815_v58  ;;  %v3823_v57 = vpack.c.bf16 %v348_v55, %v347_v54 }
  0x13   :  { %3792 = vmatpush1.bf16.msra.mxu0 %v3791_v19  ;;  %3818 = vmatpush3.bf16.msra.mxu1 %v3815_v58  ;;  %v3196_v58 = vld [vmem:[%s4854_s7 + $0x38] sm:$0xff] }
  0x14   :  { %3793 = vmatprep.subr.bf16.mxu0 %v4096_v2 }
  0x17   :  { %3795 = vmatpush1.bf16.msra.mxu0 %v3794_v22 }
  0x18   :  { %3796 = vmatprep.subr.bf16.mxu0 %v4096_v2 }
  0x1b   :  { %3798 = vmatpush1.bf16.msra.mxu0 %v3797_v25 }
  0x1c   :  { %3799 = vmatprep.subr.bf16.mxu0 %v4096_v2 }
  0x1f   :  { %3801 = vmatpush1.bf16.msra.mxu0 %v3800_v28 }
  0x20   :  { %3802 = vmatprep.subr.bf16.mxu0 %v4096_v2 }
  0x23   :  { %3804 = vmatpush1.bf16.msra.mxu0 %v3803_v31 }
  0x24   :  { %3805 = vmatprep.subr.bf16.mxu0 %v4096_v2 }
  0x27   :  { %3807 = vmatpush1.bf16.msra.mxu0 %v3806_v34 }
  0x28   :  { %3808 = vmatprep.subr.bf16.mxu0 %v4096_v2 }
  0x2b   :  { %3810 = vmatpush1.bf16.msra.mxu0 %v3809_v37 }
  0x74   :  { %v57_v38 = vpop.permute.xlu0 %56 }
  0x75   :  { %v65_v39 = vpop.permute.xlu1 %64  ;;  %v68_v41 = vsel %vm67_vm0, %v50_v40, %v57_v38 }
  0x78   :  { %v61_v42 = vpop.permute.xlu0 %60 }
  0x79   :  { %v81_v43 = vpop.permute.xlu1 %80  ;;  %v70_v44 = vsel %vm69_vm1, %v68_v41, %v61_v42 }
  0x7a   :  { %v72_v47 = vsel %vm71_vm2, %v70_v44, %v65_v39  ;;  %v91_v48 = vsel %vm67_vm0, %v3167_v45, %v81_v43 }
  0x7b   :  { %190 = vmatmul.mubr.f32.vlgmr.msra.gmra.mrb[0].mxu0 %v72_v47 }
  0x7c   :  { %v85_v49 = vpop.permute.xlu0 %84  ;;  %3174 = vmatprep.mubr.msk.f32.mxu0 %vm67_vm0, %v3171_v46 }
  0x7d   :  { %v89_v50 = vpop.permute.xlu1 %88  ;;  %v92_v51 = vsel %vm69_vm1, %v91_v48, %v85_v49  ;;  %v345_v48 = vld [vmem:[%s4854_s7] sm:$0xff]  ;;  %v346_v49 = vld [vmem:[%s4854_s7 + $0x8] sm:$0xff] }
  0x7e   :  { %v93_v52 = vsel %vm71_vm2, %v92_v51, %v89_v50  ;;  %v3193_v50 = vld [vmem:[%s4854_s7 + $0x20] sm:$0xff]  ;;  %v3819_v51 = vpack.c.bf16 %v346_v49, %v345_v48  ;;  %v4437_v48 = vld [vmem:[%s4858_s2 + $0x8] sm:$0xff] }
  0x7f   :  { %195 = vmatmul.mubr.f32.gmra.mrb[2].mxu0 %v93_v52  ;;  %v3194_v52 = vld [vmem:[%s4854_s7 + $0x28] sm:$0xff] }
  0x80   :  { %v3853_v53 = vpack.c.bf16 %v3194_v52, %v3193_v50  ;;  %3820 = vmatprep.subr.bf16.mxu1 %v3819_v51 }
  0x82   :  { %3854 = vmatprep.subr.bf16.mxu0 %v3853_v53 }
  0x83   :  { %3856 = vmatpush3.bf16.msra.mxu0 %v3853_v53 }
 0x14e   :  { %v191_v60 = vpop.f32.mrb[0].mxu0 }
 0x14f   :  { %v192_v61 = vadd.f32 %v3172_v59, %v191_v60  ;;  %v193_v62 = vpop.f32.mrb[1].mxu0  ;;  %v435_v60 = vld [vmem:[%s4855_s8] sm:$0xff] }
 0x151   :  { %v200_v63 = vmul.f32 0.2, %v192_v61 }
 0x152   :  { %v196_v0 = vpop.f32.mrb[2].mxu0 }
 0x153   :  { %v202_v1 = vmax.f32 %v192_v61, %v200_v63  ;;  %v197_v2 = vadd.f32 %v3172_v59, %v196_v0  ;;  %v198_v3 = vpop.f32.mrb[3].mxu0  ;;  %v3857_v59 = vpack.c.bf16 %v3196_v58, %v3195_v56  ;;  %v436_v61 = vld [vmem:[%s4855_s8 + $0x8] sm:$0xff]  ;;  %v3205_v63 = vld [vmem:[%s4856_s9 + $0x20] sm:$0xff] }
 0x154   :  { %v3827_v62 = vpack.c.bf16 %v436_v61, %v435_v60  ;;  %v3206_v0 = vld [vmem:[%s4856_s9 + $0x28] sm:$0xff] }
 0x155   :  { %v204_v4 = vsel %vm67_vm0, %v202_v1, 0.0  ;;  %v201_v5 = vmul.f32 0.2, %v197_v2  ;;  %3858 = vmatprep.subr.bf16.mxu0 %v3857_v59 }
 0x156   :  { %v205_v6 = vrot.slane %v204_v4, 4  ;;  %3860 = vmatpush3.bf16.msra.mxu0 %v3857_v59 }
 0x157   :  { %v203_v7 = vmax.f32 %v197_v2, %v201_v5  ;;  %v3175_v2 = vld [vmem:[%s4853_s3 + $0x1] ss:$0 sm:$0xff] }
 0x158   :  { %v206_v8 = vadd.f32 %v205_v6, %v204_v4 }
 0x159   :  { %v211_v9 = vsel %vm67_vm0, %v203_v7, 0.0 }
 0x15a   :  { %v207_v10 = vrot.slane %v206_v8, 2  ;;  %v212_v11 = vrot.slane %v211_v9, 4 }
 0x15c   :  { %v208_v12 = vadd.f32 %v207_v10, %v206_v8  ;;  %v213_v13 = vadd.f32 %v212_v11, %v211_v9  ;;  %v339_v8 = vld [vmem:[%s4857_s1] sm:$0xff]  ;;  %v340_v9 = vld [vmem:[%s4857_s1 + $0x8] sm:$0xff]  ;;  %v437_v11 = vld [vmem:[%s4855_s8 + $0x10] sm:$0xff] }
 0x15e   :  { %v214_v14 = vrot.slane %v213_v13, 2  ;;  %v209_v15 = vrot.slane %v208_v12, 1 }
 0x160   :  { %v215_v16 = vadd.f32 %v214_v14, %v213_v13  ;;  %v210_v17 = vadd.f32 %v209_v15, %v208_v12  ;;  %v438_v12 = vld [vmem:[%s4855_s8 + $0x18] sm:$0xff]  ;;  %v3207_v13 = vld [vmem:[%s4856_s9 + $0x30] sm:$0xff] }
 0x161   :  { %v3208_v14 = vld [vmem:[%s4856_s9 + $0x38] sm:$0xff] }
 0x162   :  { %v216_v18 = vrot.slane %v215_v16, 1  ;;  %v219_v19 = vmul.f32 0.125, %v210_v17  ;;  %v3831_v17 = vpack.c.bf16 %v438_v12, %v437_v11  ;;  %v3202_v11 = vld [vmem:[%s4855_s8 + $0x38] sm:$0xff] }
 0x164   :  { %v217_v20 = vadd.f32 %v216_v18, %v215_v16  ;;  %v221_v21 = vsub.f32 %v202_v1, %v219_v19  ;;  %v3869_v1 = vpack.c.bf16 %v3206_v0, %v3205_v63  ;;  %v3873_v18 = vpack.c.bf16 %v3208_v14, %v3207_v13  ;;  %v519_v19 = vld [vmem:[%s4856_s9] sm:$0xff] }
 0x166   :  { %v220_v22 = vmul.f32 0.125, %v217_v20  ;;  %v223_v23 = vmul.f32 %v221_v21, %v221_v21  ;;  %3870 = vmatprep.subr.bf16.mxu0 %v3869_v1  ;;  %v520_v20 = vld [vmem:[%s4856_s9 + $0x8] sm:$0xff] }
 0x168   :  { %v222_v24 = vsub.f32 %v203_v7, %v220_v22  ;;  %v225_v25 = vsel %vm67_vm0, %v223_v23, 0.0  ;;  %v521_v22 = vld [vmem:[%s4856_s9 + $0x10] sm:$0xff]  ;;  %v522_v23 = vld [vmem:[%s4856_s9 + $0x18] sm:$0xff] }
 0x169   :  { %v226_v26 = vrot.slane %v225_v25, 4 }
 0x16a   :  { %v224_v27 = vmul.f32 %v222_v24, %v222_v24 }
 0x16b   :  { %v227_v28 = vadd.f32 %v226_v26, %v225_v25  ;;  %v3178_v25 = vld [vmem:[%s4853_s3 + $0x2] ss:$0 sm:$0xff] }
 0x16c   :  { %v232_v29 = vsel %vm67_vm0, %v224_v27, 0.0 }
 0x16d   :  { %v233_v30 = vrot.slane %v232_v29, 4  ;;  %v228_v31 = vrot.slane %v227_v28, 2 }
 0x16f   :  { %v234_v32 = vadd.f32 %v233_v30, %v232_v29  ;;  %v229_v33 = vadd.f32 %v228_v31, %v227_v28  ;;  %v3181_v31 = vld [vmem:[%s4853_s3 + $0x3] ss:$0 sm:$0xff] }
 0x171   :  { %v235_v34 = vrot.slane %v234_v32, 2  ;;  %v230_v35 = vrot.slane %v229_v33, 1 }
 0x173   :  { %v236_v36 = vadd.f32 %v235_v34, %v234_v32  ;;  %v231_v37 = vadd.f32 %v230_v35, %v229_v33 }
 0x175   :  { %v237_v38 = vrot.slane %v236_v36, 1  ;;  %v239_v39 = vmul.f32 0.125, %v231_v37 }
 0x177   :  { %v238_v40 = vadd.f32 %v237_v38, %v236_v36  ;;  %v241_v41 = vadd.f32 1e-05, %v239_v39 }
 0x179   :  { %v240_v42 = vmul.f32 0.125, %v238_v40  ;;  %4036 = vrsqrt.f32 %v241_v41  ;;  %v4427_v40 = vld [vmem:[%s4853_s3 + $0x4] ss:$0 sm:$0xff] }
 0x17b   :  { %v242_v43 = vadd.f32 1e-05, %v240_v42 }
 0x17d   :  { %4038 = vrsqrt.f32 %v242_v43 }
 0x183   :  { %v4037_v44 = vpop.eup %4036 }
 0x184   :  { %v245_v45 = vmul.f32 %v4037_v44, %v221_v21  ;;  %v3835_v21 = vpack.c.bf16 %v520_v20, %v519_v19 }
 0x186   :  { %3491 = vmatprep.mubr.msk.f32.mxu1 %vm67_vm0, %v245_v45 }
 0x187   :  { %v4039_v46 = vpop.eup %4038 }
 0x188   :  { %v246_v47 = vmul.f32 %v4039_v46, %v222_v24  ;;  %v3839_v24 = vpack.c.bf16 %v522_v23, %v521_v22 }
 0x18a   :  { %3492 = vmatmul.mubr.msk.f32.vlgmr.msra.gmra.mrb[0].mxu1 %vm67_vm0, %v246_v47 }
 0x18b   :  { %3822 = vmatpush3.bf16.msra.mxu1 %v3819_v51  ;;  %v4442_v51 = vld [vmem:[%s4858_s2] sm:$0xff] }
 0x18c   :  { %3824 = vmatprep.subr.bf16.mxu1 %v3823_v57 }
 0x18f   :  { %3826 = vmatpush3.bf16.msra.mxu1 %v3823_v57 }
 0x190   :  { %3828 = vmatprep.subr.bf16.mxu1 %v3827_v62 }
 0x25d   :  { %v3493_v3 = vpop.f32.mrb[0].mxu1 }
 0x25e   :  { %v334_v4 = vadd.f32 %v3493_v3, %v3175_v2  ;;  %v328_v5 = vpop.f32.mrb[1].mxu1  ;;  %v3199_v3 = vld [vmem:[%s4855_s8 + $0x20] sm:$0xff] }
 0x25f   :  { %v329_v6 = vadd.f32 %v3175_v2, %v328_v5 }
 0x260   :  { %v338_v7 = vmul.f32 5.656854, %v334_v4  ;;  %v3200_v4 = vld [vmem:[%s4855_s8 + $0x28] sm:$0xff] }
 0x261   :  { %v337_v10 = vmul.f32 5.656854, %v329_v6  ;;  %v3861_v5 = vpack.c.bf16 %v3200_v4, %v3199_v3  ;;  %v3223_v3 = vld [vmem:[%s4853_s3 + $0x5] ss:$0 sm:$0xff] }
 0x262   :  { %v4367_v16 = vadd.f32 %v340_v9, %v338_v7 }
 0x263   :  { %v4365_v15 = vadd.f32 %v339_v8, %v337_v10  ;;  %v3201_v10 = vld [vmem:[%s4855_s8 + $0x30] sm:$0xff] }
 0x264   :  { %v3865_v14 = vpack.c.bf16 %v3202_v11, %v3201_v10 }
 0x265   :  { %3502 = vmatprep.mubr.msk.f32.mxu1 %vm67_vm0, %v4365_v15  ;;  %3549 = vmatprep.mubr.msk.f32.mxu0 %vm67_vm0, %v4365_v15 }
 0x266   :  { %3503 = vmatmul.mubr.msk.f32.vlgmr.msra.gmra.mrb[2].mxu1 %vm67_vm0, %v4367_v16  ;;  %3550 = vmatmul.mubr.msk.f32.vlgmr.msra.gmra.mrb[4].mxu0 %vm67_vm0, %v4367_v16 }
 0x267   :  { %3830 = vmatpush3.bf16.msra.mxu1 %v3827_v62  ;;  %3872 = vmatpush3.bf16.msra.mxu0 %v3869_v1 }
 0x268   :  { %3513 = vmatprep.mubr.msk.f32.mxu1 %vm67_vm0, %v4365_v15  ;;  %3571 = vmatprep.mubr.msk.f32.mxu0 %vm67_vm0, %v4365_v15 }
 0x269   :  { %3832 = vmatprep.subr.bf16.mxu1 %v3831_v17  ;;  %3874 = vmatprep.subr.bf16.mxu0 %v3873_v18 }
 0x26b   :  { %3834 = vmatpush3.bf16.msra.mxu1 %v3831_v17  ;;  %3876 = vmatpush3.bf16.msra.mxu0 %v3873_v18 }
 0x26c   :  { %3836 = vmatprep.subr.bf16.mxu1 %v3835_v21 }
 0x26e   :  { %3514 = vmatmul.mubr.msk.f32.vlgmr.msra.gmra.mrb[4].mxu1 %vm67_vm0, %v4367_v16  ;;  %3572 = vmatmul.mubr.msk.f32.vlgmr.msra.gmra.mrb[6].mxu0 %vm67_vm0, %v4367_v16 }
 0x26f   :  { %3838 = vmatpush3.bf16.msra.mxu1 %v3835_v21  ;;  %3524 = vmatprep.mubr.msk.f32.mxu1 %vm67_vm0, %v4365_v15 }
 0x270   :  { %3840 = vmatprep.subr.bf16.mxu1 %v3839_v24 }
 0x273   :  { %3842 = vmatpush3.bf16.msra.mxu1 %v3839_v24 }
 0x276   :  { %3525 = vmatmul.mubr.msk.f32.vlgmr.msra.gmra.mrb[6].mxu1 %vm67_vm0, %v4367_v16 }
 0x339   :  { %v3504_v26 = vpop.f32.mrb[2].mxu1  ;;  %v4404_v27 = vpop.f32.mrb[4].mxu0 }
 0x33a   :  { %v426_v28 = vpop.f32.mrb[3].mxu1  ;;  %v4406_v29 = vpop.f32.mrb[5].mxu0  ;;  %v432_v45 = vadd.f32 %v3504_v26, %v3178_v25 }
 0x33b   :  { %v427_v30 = vadd.f32 %v3178_v25, %v426_v28 }
 0x33d   :  { %3531 = vmatprep.mubr.msk.f32.mxu1 %vm603_vm3, %v427_v30 }
 0x341   :  { %v3515_v32 = vpop.f32.mrb[4].mxu1  ;;  %v4412_v33 = vpop.f32.mrb[6].mxu0 }
 0x342   :  { %v516_v34 = vadd.f32 %v3515_v32, %v3181_v31  ;;  %v510_v35 = vpop.f32.mrb[5].mxu1  ;;  %v4414_v36 = vpop.f32.mrb[7].mxu0 }
 0x343   :  { %v511_v37 = vadd.f32 %v3181_v31, %v510_v35 }
 0x345   :  { %v3843_v39 = vpack.c.bf16 %v516_v34, %v511_v37 }
 0x347   :  { %3845 = vmatprep.subr.msk.bf16.mxu1 %vm4418_vm4, %v3843_v39 }
 0x348   :  { %3848 = vmatpush3.bf16.xpose.msk.msra.mxu1 %vm4418_vm4, %v3843_v39 }
 0x349   :  { %v3526_v41 = vpop.f32.mrb[6].mxu1 }
 0x34a   :  { %v600_v42 = vadd.f32 %v3526_v41, %v4427_v40  ;;  %v594_v43 = vpop.f32.mrb[7].mxu1 }
 0x34b   :  { %v595_v44 = vadd.f32 %v4427_v40, %v594_v43 }
 0x34d   :  { %v3849_v46 = vpack.c.bf16 %v600_v42, %v595_v44 }
 0x34f   :  { %3532 = vmatmul.mubr.msk.f32.vlgmr.msra.gmra.mrb[8].mxu1 %vm603_vm3, %v432_v45  ;;  %3850 = vmatprep.subr.bf16.mxu1 %v3849_v46 }
 0x350   :  { %3852 = vmatpush3.bf16.msra.mxu1 %v3849_v46 }
 0x351   :  { %3862 = vmatprep.subr.bf16.mxu1 %v3861_v5 }
 0x422   :  { %v3533_v47 = vpop.f32.mrb[8].mxu1 }
 0x423   :  { %v692_v49 = vmul.f32 0.25, %v3533_v47  ;;  %v682_v50 = vpop.f32.mrb[9].mxu1 }
 0x424   :  { %v691_v52 = vmul.f32 0.25, %v682_v50 }
 0x425   :  { %v694_v53 = vadd.f32 %v692_v49, %v4437_v48 }
 0x426   :  { %v693_v54 = vadd.f32 %v691_v52, %v4442_v51  ;;  %v3217_v52 = vld [vmem:[%s4859_s10 + $0x10] sm:$0xff] }
 0x427   :  { %v698_v55 = vsel %vm603_vm3, %v694_v53, -inf }
 0x428   :  { %699 = vmax.xlane.f32.xlu1 %v698_v55  ;;  %v695_v56 = vsel %vm603_vm3, %v693_v54, -inf }
 0x429   :  { %696 = vmax.xlane.f32.xlu0 %v695_v56 }
 0x439   :  { %890 = vrot.lane.b32.xlu1 %v3181_v31, %s4100_s16 }
 0x4b5   :  { %v700_v57 = vpop.xlane.xlu1 %699 }
 0x4b6   :  { %v702_v58 = vsub.f32 %v694_v53, %v700_v57  ;;  %v697_v59 = vpop.xlane.xlu0 %696  ;;  %v3218_v53 = vld [vmem:[%s4859_s10 + $0x18] sm:$0xff] }
 0x4b7   :  { %v701_v60 = vsub.f32 %v693_v54, %v697_v59  ;;  %v3887_v54 = vpack.c.bf16 %v3218_v53, %v3217_v52  ;;  %v1571_v53 = vld [vmem:[%s4861_s12 + $0x10] sm:$0xff] }
 0x4b8   :  { %v705_v61 = vmul.f32 1.442695, %v702_v58 }
 0x4b9   :  { %v703_v62 = vmul.f32 1.442695, %v701_v60  ;;  %v891_v21 = vpop.permute.xlu1 %890  ;;  %3888 = vmatprep.subr.bf16.mxu0 %v3887_v54 }
 0x4ba   :  { %3890 = vmatpush3.bf16.msra.mxu0 %v3887_v54  ;;  %v1572_v54 = vld [vmem:[%s4861_s12 + $0x18] sm:$0xff] }
 0x4bb   :  { %4040 = vpow2.f32 %v703_v62 }
 0x4bc   :  { %4042 = vpow2.f32 %v705_v61 }
 0x4c5   :  { %v4041_v63 = vpop.eup %4040 }
 0x4c6   :  { %v707_v0 = vsel %vm603_vm3, %v4041_v63, 0.0  ;;  %v4043_v1 = vpop.eup %4042 }
 0x4c7   :  { %708 = vadd.xlane.f32.xlu0 %v707_v0  ;;  %v710_v2 = vsel %vm603_vm3, %v4043_v1, 0.0  ;;  %v798_v0 = vld [vmem:[%s4859_s10] sm:$0xff] }
 0x4cb   :  { %711 = vadd.xlane.f32.xlu0 %v710_v2 }
 0x4e1   :  { %806 = vrot.lane.b32.xlu0 %v3178_v25, %s4100_s16 }
 0x554   :  { %v709_v6 = vpop.xlane.xlu0 %708 }
 0x555   :  { %4044 = vrcp.f32 %v709_v6 }
 0x558   :  { %v712_v7 = vpop.xlane.xlu0 %711 }
 0x559   :  { %4046 = vrcp.f32 %v712_v7 }
 0x55c   :  { %v807_v17 = vpop.permute.xlu0 %806 }
 0x55d   :  { %v876_v18 = vadd.f32 %v4406_v29, %v807_v17  ;;  %v881_v28 = vadd.f32 %v4404_v27, %v807_v17 }
 0x55f   :  { %v4045_v8 = vpop.eup %4044 }
 0x560   :  { %v715_v9 = vmul.f32 %v4045_v8, %v4041_v63 }
 0x562   :  { %3538 = vmatprep.mubr.msk.f32.mxu1 %vm603_vm3, %v715_v9 }
 0x563   :  { %v4047_v12 = vpop.eup %4046 }
 0x564   :  { %v716_v13 = vmul.f32 %v4047_v12, %v4043_v1 }
 0x566   :  { %3539 = vmatmul.mubr.msk.f32.vlgmr.msra.gmra.mrb[10].mxu1 %vm603_vm3, %v716_v13 }
 0x567   :  { %3864 = vmatpush3.bf16.msra.mxu1 %v3861_v5  ;;  %3560 = vmatprep.mubr.msk.f32.mxu1 %vm67_vm0, %v4365_v15 }
 0x568   :  { %3866 = vmatprep.subr.bf16.mxu1 %v3865_v14 }
 0x56b   :  { %3868 = vmatpush3.bf16.msra.mxu1 %v3865_v14 }
 0x56e   :  { %3561 = vmatmul.mubr.msk.f32.vlgmr.msra.gmra.mrb[12].mxu1 %vm67_vm0, %v4367_v16 }
 0x56f   :  { %3578 = vmatprep.mubr.msk.f32.mxu1 %vm603_vm3, %v876_v18 }
 0x639   :  { %v4472_v19 = vpop.f32.mrb[10].mxu1 }
 0x63a   :  { %v4474_v20 = vpop.f32.mrb[11].mxu1 }
 0x641   :  { %v3562_v22 = vpop.f32.mrb[12].mxu1 }
 0x642   :  { %v965_v23 = vadd.f32 %v3562_v22, %v891_v21  ;;  %v959_v24 = vpop.f32.mrb[13].mxu1 }
 0x643   :  { %v960_v25 = vadd.f32 %v959_v24, %v891_v21 }
 0x645   :  { %v3877_v26 = vpack.c.bf16 %v965_v23, %v960_v25  ;;  %v1462_v23 = vld [vmem:[%s4860_s11 + $0x8] sm:$0xff]  ;;  %v1463_v25 = vld [vmem:[%s4860_s11 + $0x10] sm:$0xff] }
 0x647   :  { %3879 = vmatprep.subr.msk.bf16.mxu1 %vm4418_vm4, %v3877_v26 }
 0x648   :  { %3882 = vmatpush3.bf16.xpose.msk.msra.mxu1 %vm4418_vm4, %v3877_v26  ;;  %v1464_v26 = vld [vmem:[%s4860_s11 + $0x18] sm:$0xff] }
 0x64f   :  { %3579 = vmatmul.mubr.msk.f32.vlgmr.msra.gmra.mrb[14].mxu1 %vm603_vm3, %v881_v28  ;;  %v3899_v28 = vpack.c.bf16 %v1464_v26, %v1463_v25 }
 0x722   :  { %v3580_v29 = vpop.f32.mrb[14].mxu1 }
 0x723   :  { %v1140_v30 = vmul.f32 0.25, %v3580_v29  ;;  %v1130_v31 = vpop.f32.mrb[15].mxu1 }
 0x724   :  { %v1139_v32 = vmul.f32 0.25, %v1130_v31 }
 0x725   :  { %v1142_v34 = vadd.f32 %v1140_v30, %v4437_v48 }
 0x726   :  { %v1141_v35 = vadd.f32 %v1139_v32, %v4442_v51 }
 0x727   :  { %v1146_v37 = vsel %vm603_vm3, %v1142_v34, -inf }
 0x728   :  { %1147 = vmax.xlane.f32.xlu0 %v1146_v37  ;;  %v1143_v39 = vsel %vm603_vm3, %v1141_v35, -inf }
 0x729   :  { %1144 = vmax.xlane.f32.xlu1 %v1143_v39  ;;  %v3224_v39 = vld [vmem:[%s4853_s3 + $0x6] ss:$0 sm:$0xff] }
 0x7b5   :  { %v1148_v41 = vpop.xlane.xlu0 %1147 }
 0x7b6   :  { %v1150_v42 = vsub.f32 %v1142_v34, %v1148_v41  ;;  %v1145_v43 = vpop.xlane.xlu1 %1144 }
 0x7b7   :  { %v1149_v27 = vsub.f32 %v1141_v35, %v1145_v43 }
 0x7b8   :  { %v1153_v44 = vmul.f32 1.442695, %v1150_v42  ;;  %v3225_v42 = vld [vmem:[%s4853_s3 + $0x7] ss:$0 sm:$0xff] }
 0x7b9   :  { %v1151_v45 = vmul.f32 1.442695, %v1149_v27 }
 0x7ba   :  { %4048 = vpow2.f32 %v1153_v44 }
 0x7bb   :  { %4050 = vpow2.f32 %v1151_v45 }
 0x7c4   :  { %v4049_v46 = vpop.eup %4048 }
 0x7c5   :  { %v4051_v47 = vpop.eup %4050  ;;  %v1158_v49 = vsel %vm603_vm3, %v4049_v46, 0.0 }
 0x7c6   :  { %1159 = vadd.xlane.f32.xlu0 %v1158_v49  ;;  %v1155_v50 = vsel %vm603_vm3, %v4051_v47, 0.0  ;;  %v1569_v49 = vld [vmem:[%s4861_s12] sm:$0xff] }
 0x7c7   :  { %1156 = vadd.xlane.f32.xlu1 %v1155_v50  ;;  %v1570_v50 = vld [vmem:[%s4861_s12 + $0x8] sm:$0xff] }
 0x7c8   :  { %v3903_v52 = vpack.c.bf16 %v1570_v50, %v1569_v49  ;;  %v3237_v49 = vld [vmem:[%s4854_s7 + $0x58] sm:$0xff] }
 0x7d8   :  { %974 = vrot.lane.b32.xlu1 %v4427_v40, %s4100_s16 }
 0x853   :  { %v1160_v55 = vpop.xlane.xlu0 %1159 }
 0x854   :  { %4052 = vrcp.f32 %v1160_v55  ;;  %v1157_v56 = vpop.xlane.xlu1 %1156  ;;  %v3907_v55 = vpack.c.bf16 %v1572_v54, %v1571_v53  ;;  %v3251_v53 = vld [vmem:[%s4856_s9 + $0x58] sm:$0xff] }
 0x855   :  { %4054 = vrcp.f32 %v1157_v56  ;;  %v1573_v56 = vld [vmem:[%s4861_s12 + $0x20] sm:$0xff] }
 0x858   :  { %v975_v57 = vpop.permute.xlu1 %974 }
 0x859   :  { %v1044_v58 = vadd.f32 %v4414_v36, %v975_v57  ;;  %v1049_v40 = vadd.f32 %v4412_v33, %v975_v57  ;;  %v799_v36 = vld [vmem:[%s4859_s10 + $0x8] sm:$0xff] }
 0x85a   :  { %v3891_v33 = vpack.c.bf16 %v799_v36, %v798_v0  ;;  %v1574_v57 = vld [vmem:[%s4861_s12 + $0x28] sm:$0xff] }
 0x85b   :  { %v3883_v59 = vpack.c.bf16 %v1049_v40, %v1044_v58  ;;  %v3911_v58 = vpack.c.bf16 %v1574_v57, %v1573_v56  ;;  %v1575_v40 = vld [vmem:[%s4861_s12 + $0x30] sm:$0xff]  ;;  %v3242_v56 = vld [vmem:[%s4855_s8 + $0x48] sm:$0xff] }
 0x85c   :  { %3892 = vmatprep.subr.bf16.mxu0 %v3891_v33 }
 0x85d   :  { %3884 = vmatprep.subr.bf16.mxu1 %v3883_v59 }
 0x85e   :  { %v4053_v60 = vpop.eup %4052  ;;  %3886 = vmatpush3.bf16.msra.mxu1 %v3883_v59  ;;  %v1576_v59 = vld [vmem:[%s4861_s12 + $0x38] sm:$0xff] }
 0x85f   :  { %v4055_v61 = vpop.eup %4054  ;;  %v1164_v63 = vmul.f32 %v4053_v60, %v4049_v46  ;;  %v3915_v60 = vpack.c.bf16 %v1576_v59, %v1575_v40 }
 0x860   :  { %v1163_v62 = vmul.f32 %v4055_v61, %v4051_v47  ;;  %v3226_v61 = vld [vmem:[%s4862_s4] ss:$0 sm:$0xff] }
 0x862   :  { %3585 = vmatprep.mubr.msk.f32.mxu1 %vm603_vm3, %v1163_v62 }
 0x863   :  { %3586 = vmatmul.mubr.msk.f32.vlgmr.msra.gmra.mrb[16].mxu1 %vm603_vm3, %v1164_v63 }
 0x936   :  { %v3587_v1 = vpop.f32.mrb[16].mxu1 }
 0x937   :  { %v1237_v2 = vpop.f32.mrb[17].mxu1 }
 0x938   :  { %3592 = vmatprep.mubr.msk.f32.mxu0 %vm603_vm3, %v1237_v2 }
 0x939   :  { %3593 = vmatmul.mubr.msk.f32.vlgmr.msra.gmra.mrb[8].mxu0 %vm603_vm3, %v3587_v1 }
 0x93a   :  { %3894 = vmatpush3.bf16.msra.mxu0 %v3891_v33  ;;  %3599 = vmatprep.mubr.msk.f32.mxu0 %vm603_vm3, %v4474_v20 }
 0x93b   :  { %3904 = vmatprep.subr.bf16.mxu0 %v3903_v52 }
 0x941   :  { %3600 = vmatmul.mubr.msk.f32.vlgmr.msra.gmra.mrb[8].mxu0 %vm603_vm3, %v4472_v19 }
 0x942   :  { %3906 = vmatpush3.bf16.msra.mxu0 %v3903_v52  ;;  %v3250_v52 = vld [vmem:[%s4856_s9 + $0x50] sm:$0xff] }
 0x943   :  { %3908 = vmatprep.subr.bf16.mxu0 %v3907_v55  ;;  %v3939_v54 = vpack.c.bf16 %v3251_v53, %v3250_v52 }
 0x946   :  { %3910 = vmatpush3.bf16.msra.mxu0 %v3907_v55  ;;  %v3241_v55 = vld [vmem:[%s4855_s8 + $0x40] sm:$0xff] }
 0x947   :  { %3912 = vmatprep.subr.bf16.mxu0 %v3911_v58  ;;  %v3927_v57 = vpack.c.bf16 %v3242_v56, %v3241_v55 }
 0x94a   :  { %3914 = vmatpush3.bf16.msra.mxu0 %v3911_v58 }
 0x94b   :  { %3916 = vmatprep.subr.bf16.mxu0 %v3915_v60 }
 0x94e   :  { %3918 = vmatpush3.bf16.msra.mxu0 %v3915_v60 }
 0xa14   :  { %v3601_v4 = vpop.f32.mrb[8].mxu0 }
 0xa15   :  { %v1402_v5 = vpop.f32.mrb[9].mxu0  ;;  %v1417_v6 = vadd.f32 %v3601_v4, %v3223_v3 }
 0xa16   :  { %v1416_v7 = vadd.f32 %v3223_v3, %v1402_v5 }
 0xa17   :  { %v1419_v10 = vadd.f32 %v1417_v6, %v4367_v16  ;;  %v1461_v16 = vld [vmem:[%s4860_s11] sm:$0xff] }
 0xa18   :  { %v1418_v8 = vadd.f32 %v1416_v7, %v4365_v15  ;;  %v3895_v24 = vpack.c.bf16 %v1462_v23, %v1461_v16 }
 0xa19   :  { %v1423_v11 = vsel %vm67_vm0, %v1419_v10, 0.0 }
 0xa1a   :  { %v1420_v9 = vsel %vm67_vm0, %v1418_v8, 0.0  ;;  %3896 = vmatprep.subr.bf16.mxu1 %v3895_v24 }
 0xa1b   :  { %1421 = vadd.xlane.f32.xlu0 %v1420_v9  ;;  %3898 = vmatpush3.bf16.msra.mxu1 %v3895_v24 }
 0xa1c   :  { %3900 = vmatprep.subr.bf16.mxu1 %v3899_v28 }
 0xa1f   :  { %1424 = vadd.xlane.f32.xlu0 %v1423_v11  ;;  %3902 = vmatpush3.bf16.msra.mxu1 %v3899_v28 }
 0xaa8   :  { %v1422_v12 = vpop.xlane.xlu0 %1421 }
 0xaa9   :  { %v1427_v13 = vmul.f32 0.03125, %v1422_v12 }
 0xaab   :  { %v1429_v14 = vsub.f32 %v1418_v8, %v1427_v13 }
 0xaac   :  { %v1425_v17 = vpop.xlane.xlu0 %1424 }
 0xaad   :  { %v1428_v18 = vmul.f32 0.03125, %v1425_v17  ;;  %v1431_v19 = vmul.f32 %v1429_v14, %v1429_v14 }
 0xaaf   :  { %v1430_v20 = vsub.f32 %v1419_v10, %v1428_v18  ;;  %v1433_v21 = vsel %vm67_vm0, %v1431_v19, 0.0 }
 0xab0   :  { %1434 = vadd.xlane.f32.xlu0 %v1433_v21 }
 0xab1   :  { %v1432_v22 = vmul.f32 %v1430_v20, %v1430_v20 }
 0xab3   :  { %v1436_v15 = vsel %vm67_vm0, %v1432_v22, 0.0 }
 0xab4   :  { %1437 = vadd.xlane.f32.xlu0 %v1436_v15 }
 0xb3d   :  { %v1435_v29 = vpop.xlane.xlu0 %1434 }
 0xb3e   :  { %v1439_v30 = vmul.f32 0.03125, %v1435_v29 }
 0xb40   :  { %v1441_v31 = vadd.f32 1e-05, %v1439_v30 }
 0xb41   :  { %v1438_v32 = vpop.xlane.xlu0 %1437 }
 0xb42   :  { %4056 = vrsqrt.f32 %v1441_v31  ;;  %v1440_v34 = vmul.f32 0.03125, %v1438_v32 }
 0xb44   :  { %v1442_v35 = vadd.f32 1e-05, %v1440_v34 }
 0xb46   :  { %4058 = vrsqrt.f32 %v1442_v35 }
 0xb4c   :  { %v4057_v37 = vpop.eup %4056 }
 0xb4d   :  { %v1445_v41 = vmul.f32 %v4057_v37, %v1429_v14 }
 0xb4f   :  { %v1452_v43 = vmul.f32 %v3224_v39, %v1445_v41 }
 0xb50   :  { %v4059_v27 = vpop.eup %4058 }
 0xb51   :  { %v1446_v44 = vmul.f32 %v4059_v27, %v1430_v20  ;;  %v1459_v45 = vadd.f32 %v3225_v42, %v1452_v43  ;;  %v3229_v20 = vld [vmem:[%s4853_s3 + $0xa] ss:$0 sm:$0xff] }
 0xb52   :  { %v3235_v43 = vld [vmem:[%s4854_s7 + $0x48] sm:$0xff] }
 0xb53   :  { %v1453_v46 = vmul.f32 %v3224_v39, %v1446_v44  ;;  %3610 = vmatprep.mubr.msk.f32.mxu1 %vm67_vm0, %v1459_v45  ;;  %v3248_v44 = vld [vmem:[%s4856_s9 + $0x40] sm:$0xff] }
 0xb55   :  { %v1460_v47 = vadd.f32 %v3225_v42, %v1453_v46  ;;  %v3234_v42 = vld [vmem:[%s4854_s7 + $0x40] sm:$0xff] }
 0xb56   :  { %v3919_v27 = vpack.c.bf16 %v3235_v43, %v3234_v42  ;;  %v3278_v42 = vld [vmem:[%s4856_s9 + $0x78] sm:$0xff] }
 0xb57   :  { %3611 = vmatmul.mubr.msk.f32.vlgmr.msra.gmra.mrb[18].mxu1 %vm67_vm0, %v1460_v47 }
 0xb58   :  { %3920 = vmatprep.subr.bf16.mxu1 %v3919_v27 }
 0xb59   :  { %3922 = vmatpush3.bf16.msra.mxu1 %v3919_v27 }
 0xc2a   :  { %v3612_v62 = vpop.f32.mrb[18].mxu1 }
 0xc2b   :  { %v1548_v63 = vadd.f32 %v3612_v62, %v3226_v61  ;;  %v1542_v0 = vpop.f32.mrb[19].mxu1 }
 0xc2c   :  { %v1543_v36 = vadd.f32 %v3226_v61, %v1542_v0  ;;  %v3232_v0 = vld [vmem:[%s4853_s3 + $0x8] ss:$0 sm:$0xff] }
 0xc2d   :  { %v1552_v33 = vmul.f32 %v1548_v63, %v1548_v63 }
 0xc2e   :  { %v1551_v1 = vmul.f32 %v1543_v36, %v1543_v36 }
 0xc2f   :  { %v1554_v2 = vmul.f32 %v1552_v33, %v1548_v63  ;;  %v3233_v33 = vld [vmem:[%s4853_s3 + $0x9] ss:$0 sm:$0xff] }
 0xc30   :  { %v1553_v3 = vmul.f32 %v1551_v1, %v1543_v36 }
 0xc31   :  { %v1556_v4 = vmul.f32 0.044715, %v1554_v2 }
 0xc32   :  { %v1555_v5 = vmul.f32 0.044715, %v1553_v3 }
 0xc33   :  { %v1558_v6 = vadd.f32 %v1556_v4, %v1548_v63 }
 0xc34   :  { %v1557_v7 = vadd.f32 %v1555_v5, %v1543_v36  ;;  %v3243_v5 = vld [vmem:[%s4855_s8 + $0x50] sm:$0xff] }
 0xc35   :  { %v1560_v8 = vmul.f32 0.7978846, %v1558_v6  ;;  %v3244_v6 = vld [vmem:[%s4855_s8 + $0x58] sm:$0xff] }
 0xc36   :  { %v1559_v9 = vmul.f32 0.7978846, %v1557_v7 }
 0xc37   :  { %4060 = vtanh.f32 %v1560_v8 }
 0xc38   :  { %4062 = vtanh.f32 %v1559_v9  ;;  %v3931_v9 = vpack.c.bf16 %v3244_v6, %v3243_v5 }
 0xc41   :  { %v4061_v10 = vpop.eup %4060 }
 0xc42   :  { %v4063_v11 = vpop.eup %4062  ;;  %v1564_v12 = vadd.f32 1.0, %v4061_v10  ;;  %v3238_v10 = vld [vmem:[%s4853_s3 + $0xb] ss:$0 sm:$0xff] }
 0xc43   :  { %v1563_v13 = vadd.f32 1.0, %v4063_v11  ;;  %v4642_v11 = vld [vmem:[%s4853_s3 + $0xd] ss:$0 sm:$0xff] }
 0xc44   :  { %v1566_v14 = vmul.f32 0.5, %v1564_v12 }
 0xc45   :  { %v1565_v17 = vmul.f32 0.5, %v1563_v13 }
 0xc46   :  { %v1568_v19 = vmul.f32 %v1566_v14, %v1548_v63 }
 0xc47   :  { %v1567_v18 = vmul.f32 %v1565_v17, %v1543_v36 }
 0xc49   :  { %3629 = vmatprep.mubr.msk.f32.mxu0 %vm69_vm1, %v1567_v18 }
 0xc4a   :  { %3630 = vmatmul.mubr.msk.f32.vlgmr.msra.gmra.mrb[10].mxu0 %vm69_vm1, %v1568_v19 }
 0xd1d   :  { %v3631_v21 = vpop.f32.mrb[10].mxu0 }
 0xd1e   :  { %v1660_v22 = vadd.f32 %v3631_v21, %v3229_v20  ;;  %v1654_v15 = vpop.f32.mrb[11].mxu0 }
 0xd1f   :  { %v1655_v16 = vadd.f32 %v3229_v20, %v1654_v15 }
 0xd20   :  { %v1664_v23 = vadd.f32 %v1660_v22, %v1460_v47  ;;  %v3236_v47 = vld [vmem:[%s4854_s7 + $0x50] sm:$0xff]  ;;  %v3245_v22 = vld [vmem:[%s4853_s3 + $0xc] ss:$0 sm:$0xff] }
 0xd21   :  { %v1663_v24 = vadd.f32 %v1655_v16, %v1459_v45  ;;  %v3249_v45 = vld [vmem:[%s4856_s9 + $0x48] sm:$0xff]  ;;  %v3923_v50 = vpack.c.bf16 %v3237_v49, %v3236_v47 }
 0xd22   :  { %v1668_v25 = vsel %vm67_vm0, %v1664_v23, 0.0  ;;  %v3935_v46 = vpack.c.bf16 %v3249_v45, %v3248_v44 }
 0xd23   :  { %1669 = vadd.xlane.f32.xlu0 %v1668_v25  ;;  %v1665_v26 = vsel %vm67_vm0, %v1663_v24, 0.0  ;;  %3924 = vmatprep.subr.bf16.mxu1 %v3923_v50  ;;  %v3264_v25 = vld [vmem:[%s4854_s7 + $0x68] sm:$0xff] }
 0xd24   :  { %1666 = vadd.xlane.f32.xlu1 %v1665_v26  ;;  %3936 = vmatprep.subr.bf16.mxu0 %v3935_v46 }
 0xd25   :  { %3938 = vmatpush3.bf16.msra.mxu0 %v3935_v46  ;;  %3926 = vmatpush3.bf16.msra.mxu1 %v3923_v50 }
 0xd26   :  { %3940 = vmatprep.subr.bf16.mxu0 %v3939_v54  ;;  %3928 = vmatprep.subr.bf16.mxu1 %v3927_v57 }
 0xd29   :  { %3942 = vmatpush3.bf16.msra.mxu0 %v3939_v54 }
 0xd35   :  { %2169 = vrot.lane.b32.xlu1 %v3238_v10, %s4100_s16 }
 0xdb0   :  { %v1670_v28 = vpop.xlane.xlu0 %1669 }
 0xdb1   :  { %v1672_v29 = vmul.f32 0.03125, %v1670_v28  ;;  %v1667_v30 = vpop.xlane.xlu1 %1666 }
 0xdb2   :  { %v1671_v31 = vmul.f32 0.03125, %v1667_v30  ;;  %v3265_v30 = vld [vmem:[%s4854_s7 + $0x70] sm:$0xff] }
 0xdb3   :  { %v1674_v32 = vsub.f32 %v1664_v23, %v1672_v29 }
 0xdb4   :  { %v1673_v34 = vsub.f32 %v1663_v24, %v1671_v31  ;;  %v3263_v24 = vld [vmem:[%s4854_s7 + $0x60] sm:$0xff]  ;;  %v3266_v31 = vld [vmem:[%s4854_s7 + $0x78] sm:$0xff] }
 0xdb5   :  { %v1676_v39 = vmul.f32 %v1674_v32, %v1674_v32  ;;  %v3953_v29 = vpack.c.bf16 %v3264_v25, %v3263_v24 }
 0xdb6   :  { %v1675_v35 = vmul.f32 %v1673_v34, %v1673_v34 }
 0xdb7   :  { %v1680_v41 = vsel %vm67_vm0, %v1676_v39, 0.0 }
 0xdb8   :  { %v1677_v37 = vsel %vm67_vm0, %v1675_v35, 0.0  ;;  %v3275_v35 = vld [vmem:[%s4856_s9 + $0x60] sm:$0xff] }
 0xdb9   :  { %1678 = vadd.xlane.f32.xlu0 %v1677_v37  ;;  %v3276_v37 = vld [vmem:[%s4856_s9 + $0x68] sm:$0xff] }
 0xdba   :  { %v3969_v39 = vpack.c.bf16 %v3276_v37, %v3275_v35 }
 0xdbd   :  { %1681 = vadd.xlane.f32.xlu0 %v1680_v41  ;;  %v3277_v41 = vld [vmem:[%s4856_s9 + $0x70] sm:$0xff] }
 0xdbe   :  { %v3973_v43 = vpack.c.bf16 %v3278_v42, %v3277_v41 }
 0xe46   :  { %v1679_v58 = vpop.xlane.xlu0 %1678 }
 0xe47   :  { %v1683_v40 = vmul.f32 0.03125, %v1679_v58 }
 0xe49   :  { %v1685_v59 = vadd.f32 1e-05, %v1683_v40 }
 0xe4a   :  { %v1682_v60 = vpop.xlane.xlu0 %1681 }
 0xe4b   :  { %4064 = vrsqrt.f32 %v1685_v59  ;;  %v1684_v61 = vmul.f32 0.03125, %v1682_v60 }
 0xe4d   :  { %v1686_v62 = vadd.f32 1e-05, %v1684_v61 }
 0xe4f   :  { %4066 = vrsqrt.f32 %v1686_v62 }
 0xe55   :  { %v4065_v63 = vpop.eup %4064 }
 0xe56   :  { %v1689_v36 = vmul.f32 %v4065_v63, %v1673_v34  ;;  %v3957_v34 = vpack.c.bf16 %v3266_v31, %v3265_v30 }
 0xe58   :  { %v1696_v1 = vmul.f32 %v3232_v0, %v1689_v36 }
 0xe59   :  { %v4067_v2 = vpop.eup %4066 }
 0xe5a   :  { %v4613_v3 = vadd.f32 %v3233_v33, %v1696_v1  ;;  %v1690_v4 = vmul.f32 %v4067_v2, %v1674_v32  ;;  %v3270_v1 = vld [vmem:[%s4855_s8 + $0x68] sm:$0xff] }
 0xe5c   :  { %v1697_v7 = vmul.f32 %v3232_v0, %v1690_v4  ;;  %3640 = vmatprep.mubr.msk.f32.mxu1 %vm67_vm0, %v4613_v3  ;;  %3662 = vmatprep.mubr.msk.f32.mxu0 %vm67_vm0, %v4613_v3 }
 0xe5e   :  { %v4625_v8 = vadd.f32 %v3233_v33, %v1697_v7  ;;  %v3269_v33 = vld [vmem:[%s4855_s8 + $0x60] sm:$0xff] }
 0xe5f   :  { %v3961_v2 = vpack.c.bf16 %v3270_v1, %v3269_v33 }
 0xe60   :  { %3641 = vmatmul.mubr.msk.f32.vlgmr.msra.gmra.mrb[20].mxu1 %vm67_vm0, %v4625_v8  ;;  %3663 = vmatmul.mubr.msk.f32.vlgmr.msra.gmra.mrb[12].mxu0 %vm67_vm0, %v4625_v8 }
 0xe61   :  { %3930 = vmatpush3.bf16.msra.mxu1 %v3927_v57  ;;  %3651 = vmatprep.mubr.msk.f32.mxu1 %vm67_vm0, %v4613_v3 }
 0xe62   :  { %3932 = vmatprep.subr.bf16.mxu1 %v3931_v9 }
 0xe65   :  { %3934 = vmatpush3.bf16.msra.mxu1 %v3931_v9  ;;  %v3271_v9 = vld [vmem:[%s4855_s8 + $0x70] sm:$0xff] }
 0xe68   :  { %3652 = vmatmul.mubr.msk.f32.vlgmr.msra.gmra.mrb[22].mxu1 %vm67_vm0, %v4625_v8 }
 0xf33   :  { %v3642_v12 = vpop.f32.mrb[20].mxu1  ;;  %v3664_v13 = vpop.f32.mrb[12].mxu0 }
 0xf34   :  { %v1963_v14 = vadd.f32 %v3664_v13, %v4642_v11  ;;  %v1787_v17 = vpop.f32.mrb[21].mxu1  ;;  %v1957_v18 = vpop.f32.mrb[13].mxu0  ;;  %v1793_v32 = vadd.f32 %v3642_v12, %v3238_v10 }
 0xf35   :  { %v1788_v19 = vadd.f32 %v3238_v10, %v1787_v17  ;;  %v1958_v20 = vadd.f32 %v4642_v11, %v1957_v18  ;;  %v3272_v10 = vld [vmem:[%s4855_s8 + $0x78] sm:$0xff]  ;;  %v2170_v17 = vpop.permute.xlu1 %2169 }
 0xf37   :  { %v3949_v21 = vpack.c.bf16 %v1963_v14, %v1958_v20  ;;  %3669 = vmatprep.mubr.msk.f32.mxu1 %vm603_vm3, %v1788_v19  ;;  %v3965_v14 = vpack.c.bf16 %v3272_v10, %v3271_v9 }
 0xf39   :  { %3950 = vmatprep.subr.bf16.mxu0 %v3949_v21 }
 0xf3a   :  { %3952 = vmatpush3.bf16.msra.mxu0 %v3949_v21 }
 0xf3b   :  { %v3653_v15 = vpop.f32.mrb[22].mxu1  ;;  %3962 = vmatprep.subr.bf16.mxu0 %v3961_v2 }
 0xf3c   :  { %v1878_v16 = vadd.f32 %v3653_v15, %v3245_v22  ;;  %v1872_v23 = vpop.f32.mrb[23].mxu1 }
 0xf3d   :  { %v1873_v26 = vadd.f32 %v3245_v22, %v1872_v23 }
 0xf3f   :  { %v3943_v28 = vpack.c.bf16 %v1878_v16, %v1873_v26 }
 0xf41   :  { %3945 = vmatprep.subr.msk.bf16.mxu1 %vm4418_vm4, %v3943_v28 }
 0xf42   :  { %3948 = vmatpush3.bf16.xpose.msk.msra.mxu1 %vm4418_vm4, %v3943_v28 }
 0xf43   :  { %3954 = vmatprep.subr.bf16.mxu1 %v3953_v29 }
 0xf49   :  { %3670 = vmatmul.mubr.msk.f32.vlgmr.msra.gmra.mrb[24].mxu1 %vm603_vm3, %v1793_v32 }
 0xf4a   :  { %3956 = vmatpush3.bf16.msra.mxu1 %v3953_v29  ;;  %3687 = vmatprep.mubr.msk.f32.mxu1 %vm67_vm0, %v4613_v3 }
 0xf4b   :  { %3958 = vmatprep.subr.bf16.mxu1 %v3957_v34 }
 0xf4e   :  { %3960 = vmatpush3.bf16.msra.mxu1 %v3957_v34 }
 0xf4f   :  { %3970 = vmatprep.subr.bf16.mxu1 %v3969_v39 }
 0xf51   :  { %3688 = vmatmul.mubr.msk.f32.vlgmr.msra.gmra.mrb[26].mxu1 %vm67_vm0, %v4625_v8 }
 0xf52   :  { %3972 = vmatpush3.bf16.msra.mxu1 %v3969_v39  ;;  %3709 = vmatprep.mubr.msk.f32.mxu1 %vm67_vm0, %v4613_v3 }
 0xf53   :  { %3974 = vmatprep.subr.bf16.mxu1 %v3973_v43 }
 0xf56   :  { %3976 = vmatpush3.bf16.msra.mxu1 %v3973_v43 }
 0xf59   :  { %3710 = vmatmul.mubr.msk.f32.vlgmr.msra.gmra.mrb[28].mxu1 %vm67_vm0, %v4625_v8 }
0x101c   :  { %v3671_v27 = vpop.f32.mrb[24].mxu1 }
0x101d   :  { %v2044_v44 = vpop.f32.mrb[25].mxu1  ;;  %v2054_v45 = vmul.f32 0.25, %v3671_v27 }
0x101e   :  { %v2053_v46 = vmul.f32 0.25, %v2044_v44 }
0x101f   :  { %v2056_v50 = vadd.f32 %v2054_v45, %v4437_v48 }
0x1020   :  { %v2055_v47 = vadd.f32 %v2053_v46, %v4442_v51 }
0x1021   :  { %v2060_v54 = vsel %vm603_vm3, %v2056_v50, -inf }
0x1022   :  { %v2057_v49 = vsel %vm603_vm3, %v2055_v47, -inf }
0x1023   :  { %2058 = vmax.xlane.f32.xlu0 %v2057_v49  ;;  %v3287_v49 = vld [vmem:[%s4859_s10 + $0x30] sm:$0xff] }
0x1024   :  { %v3689_v52 = vpop.f32.mrb[26].mxu1 }
0x1025   :  { %v2238_v53 = vpop.f32.mrb[27].mxu1  ;;  %v2244_v25 = vadd.f32 %v3689_v52, %v2170_v17 }
0x1026   :  { %v2239_v18 = vadd.f32 %v2238_v53, %v2170_v17 }
0x1027   :  { %2061 = vmax.xlane.f32.xlu0 %v2060_v54 }
0x102c   :  { %v4691_v55 = vpop.f32.mrb[28].mxu1 }
0x102d   :  { %v4693_v56 = vpop.f32.mrb[29].mxu1 }
0x10b0   :  { %v2059_v57 = vpop.xlane.xlu0 %2058 }
0x10b1   :  { %v2063_v58 = vsub.f32 %v2055_v47, %v2059_v57 }
0x10b3   :  { %v2065_v40 = vmul.f32 1.442695, %v2063_v58 }
0x10b4   :  { %v2062_v59 = vpop.xlane.xlu0 %2061 }
0x10b5   :  { %4068 = vpow2.f32 %v2065_v40  ;;  %v2064_v60 = vsub.f32 %v2056_v50, %v2062_v59  ;;  %v3288_v50 = vld [vmem:[%s4859_s10 + $0x38] sm:$0xff]  ;;  %v3261_v40 = vld [vmem:[%s4859_s10 + $0x20] sm:$0xff]  ;;  %v3262_v59 = vld [vmem:[%s4859_s10 + $0x28] sm:$0xff] }
0x10b6   :  { %v3987_v52 = vpack.c.bf16 %v3288_v50, %v3287_v49  ;;  %v3309_v49 = vld [vmem:[%s4861_s12 + $0x70] sm:$0xff]  ;;  %v3310_v50 = vld [vmem:[%s4861_s12 + $0x78] sm:$0xff] }
0x10b7   :  { %v2067_v61 = vmul.f32 1.442695, %v2064_v60  ;;  %v3991_v60 = vpack.c.bf16 %v3262_v59, %v3261_v40 }
0x10b9   :  { %4070 = vpow2.f32 %v2067_v61 }
0x10bf   :  { %v4069_v62 = vpop.eup %4068 }
0x10c0   :  { %v2069_v63 = vsel %vm603_vm3, %v4069_v62, 0.0 }
0x10c1   :  { %2070 = vadd.xlane.f32.xlu0 %v2069_v63  ;;  %v3293_v63 = vld [vmem:[%s4853_s3 + $0xe] ss:$0 sm:$0xff] }
0x10c3   :  { %v4071_v0 = vpop.eup %4070 }
0x10c4   :  { %v2072_v36 = vsel %vm603_vm3, %v4071_v0, 0.0 }
0x10c5   :  { %2073 = vadd.xlane.f32.xlu0 %v2072_v36 }
0x10db   :  { %2253 = vrot.lane.b32.xlu0 %v3245_v22, %s4100_s16 }
0x114e   :  { %v2071_v4 = vpop.xlane.xlu0 %2070 }
0x114f   :  { %4072 = vrcp.f32 %v2071_v4 }
0x1152   :  { %v2074_v5 = vpop.xlane.xlu0 %2073 }
0x1153   :  { %4074 = vrcp.f32 %v2074_v5 }
0x1156   :  { %v2254_v21 = vpop.permute.xlu0 %2253 }
0x1159   :  { %v4073_v6 = vpop.eup %4072 }
0x115a   :  { %v2077_v7 = vmul.f32 %v4073_v6, %v4069_v62 }
0x115c   :  { %3676 = vmatprep.mubr.msk.f32.mxu0 %vm603_vm3, %v2077_v7 }
0x115d   :  { %v4075_v12 = vpop.eup %4074 }
0x115e   :  { %v2078_v13 = vmul.f32 %v4075_v12, %v4071_v0 }
0x1160   :  { %3677 = vmatmul.mubr.msk.f32.vlgmr.msra.gmra.mrb[14].mxu0 %vm603_vm3, %v2078_v13 }
0x1161   :  { %3964 = vmatpush3.bf16.msra.mxu0 %v3961_v2  ;;  %3698 = vmatprep.mubr.msk.f32.mxu0 %vm67_vm0, %v4613_v3 }
0x1162   :  { %3966 = vmatprep.subr.bf16.mxu0 %v3965_v14 }
0x1165   :  { %3968 = vmatpush3.bf16.msra.mxu0 %v3965_v14 }
0x1168   :  { %3699 = vmatmul.mubr.msk.f32.vlgmr.msra.gmra.mrb[16].mxu0 %vm67_vm0, %v4625_v8 }
0x1169   :  { %3716 = vmatprep.mubr.msk.f32.mxu0 %vm603_vm3, %v2239_v18 }
0x1233   :  { %v4717_v19 = vpop.f32.mrb[14].mxu0 }
0x1234   :  { %v4719_v20 = vpop.f32.mrb[15].mxu0 }
0x123b   :  { %v3700_v22 = vpop.f32.mrb[16].mxu0 }
0x123c   :  { %v2328_v15 = vadd.f32 %v3700_v22, %v2254_v21  ;;  %v2322_v16 = vpop.f32.mrb[17].mxu0  ;;  %v3298_v22 = vld [vmem:[%s4860_s11 + $0x30] sm:$0xff] }
0x123d   :  { %v2323_v23 = vadd.f32 %v2322_v16, %v2254_v21 }
0x123f   :  { %v3977_v24 = vpack.c.bf16 %v2328_v15, %v2323_v23  ;;  %v3299_v15 = vld [vmem:[%s4860_s11 + $0x38] sm:$0xff] }
0x1240   :  { %v3999_v16 = vpack.c.bf16 %v3299_v15, %v3298_v22 }
0x1241   :  { %3979 = vmatprep.subr.msk.bf16.mxu0 %vm4418_vm4, %v3977_v24 }
0x1242   :  { %3982 = vmatpush3.bf16.xpose.msk.msra.mxu0 %vm4418_vm4, %v3977_v24 }
0x1243   :  { %3988 = vmatprep.subr.bf16.mxu0 %v3987_v52 }
0x1249   :  { %3717 = vmatmul.mubr.msk.f32.vlgmr.msra.gmra.mrb[18].mxu0 %vm603_vm3, %v2244_v25 }
0x124a   :  { %3990 = vmatpush3.bf16.msra.mxu0 %v3987_v52  ;;  %v4015_v52 = vpack.c.bf16 %v3310_v50, %v3309_v49 }
0x124b   :  { %3992 = vmatprep.subr.bf16.mxu0 %v3991_v60 }
0x131c   :  { %v3718_v26 = vpop.f32.mrb[18].mxu0 }
0x131d   :  { %v2503_v28 = vmul.f32 0.25, %v3718_v26  ;;  %v2493_v29 = vpop.f32.mrb[19].mxu0 }
0x131e   :  { %v2502_v30 = vmul.f32 0.25, %v2493_v29 }
0x131f   :  { %v2505_v31 = vadd.f32 %v2503_v28, %v4437_v48 }
0x1320   :  { %v2504_v32 = vadd.f32 %v2502_v30, %v4442_v51 }
0x1321   :  { %v2509_v34 = vsel %vm603_vm3, %v2505_v31, -inf }
0x1322   :  { %2510 = vmax.xlane.f32.xlu1 %v2509_v34  ;;  %v2506_v35 = vsel %vm603_vm3, %v2504_v32, -inf  ;;  %v3295_v34 = vld [vmem:[%s4853_s3 + $0x10] ss:$0 sm:$0xff] }
0x1323   :  { %2507 = vmax.xlane.f32.xlu0 %v2506_v35 }
0x1333   :  { %2337 = vrot.lane.b32.xlu1 %v4642_v11, %s4100_s16 }
0x13af   :  { %v2511_v38 = vpop.xlane.xlu1 %2510 }
0x13b0   :  { %v2513_v37 = vsub.f32 %v2505_v31, %v2511_v38  ;;  %v2508_v39 = vpop.xlane.xlu0 %2507  ;;  %v3294_v31 = vld [vmem:[%s4853_s3 + $0xf] ss:$0 sm:$0xff] }
0x13b1   :  { %v2512_v41 = vsub.f32 %v2504_v32, %v2508_v39 }
0x13b2   :  { %v2516_v42 = vmul.f32 1.442695, %v2513_v37 }
0x13b3   :  { %v2514_v43 = vmul.f32 1.442695, %v2512_v41  ;;  %v2338_v27 = vpop.permute.xlu1 %2337 }
0x13b4   :  { %v2407_v48 = vadd.f32 %v4693_v56, %v2338_v27  ;;  %v2412_v51 = vadd.f32 %v4691_v55, %v2338_v27  ;;  %v3304_v27 = vld [vmem:[%s4861_s12 + $0x48] sm:$0xff] }
0x13b5   :  { %4076 = vpow2.f32 %v2514_v43  ;;  %v3303_v43 = vld [vmem:[%s4861_s12 + $0x40] sm:$0xff] }
0x13b6   :  { %v3983_v44 = vpack.c.bf16 %v2412_v51, %v2407_v48  ;;  %4078 = vpow2.f32 %v2516_v42  ;;  %v4003_v48 = vpack.c.bf16 %v3304_v27, %v3303_v43  ;;  %v3305_v51 = vld [vmem:[%s4861_s12 + $0x50] sm:$0xff] }
0x13b8   :  { %3984 = vmatprep.subr.bf16.mxu1 %v3983_v44 }
0x13b9   :  { %3986 = vmatpush3.bf16.msra.mxu1 %v3983_v44  ;;  %v3306_v44 = vld [vmem:[%s4861_s12 + $0x58] sm:$0xff] }
0x13bf   :  { %v4077_v45 = vpop.eup %4076 }
0x13c0   :  { %v2518_v46 = vsel %vm603_vm3, %v4077_v45, 0.0  ;;  %v4079_v11 = vpop.eup %4078 }
0x13c1   :  { %2519 = vadd.xlane.f32.xlu0 %v2518_v46  ;;  %v2521_v47 = vsel %vm603_vm3, %v4079_v11, 0.0  ;;  %v3307_v46 = vld [vmem:[%s4861_s12 + $0x60] sm:$0xff] }
0x13c5   :  { %2522 = vadd.xlane.f32.xlu0 %v2521_v47 }
0x144e   :  { %v2520_v53 = vpop.xlane.xlu0 %2519 }
0x144f   :  { %4080 = vrcp.f32 %v2520_v53  ;;  %v3300_v53 = vld [vmem:[%s4862_s4 + $0x1] ss:$0 sm:$0xff] }
0x1452   :  { %v2523_v54 = vpop.xlane.xlu0 %2522 }
0x1453   :  { %4082 = vrcp.f32 %v2523_v54 }
0x1459   :  { %v4081_v55 = vpop.eup %4080 }
0x145a   :  { %v2526_v56 = vmul.f32 %v4081_v55, %v4077_v45  ;;  %v4007_v45 = vpack.c.bf16 %v3306_v44, %v3305_v51  ;;  %v3314_v51 = vld [vmem:[%s4853_s3 + $0x11] ss:$0 sm:$0xff] }
0x145c   :  { %3723 = vmatprep.mubr.msk.f32.mxu1 %vm603_vm3, %v2526_v56 }
0x145d   :  { %v4083_v57 = vpop.eup %4082 }
0x145e   :  { %v2527_v58 = vmul.f32 %v4083_v57, %v4079_v11  ;;  %v3308_v11 = vld [vmem:[%s4861_s12 + $0x68] sm:$0xff] }
0x145f   :  { %v4011_v47 = vpack.c.bf16 %v3308_v11, %v3307_v46 }
0x1460   :  { %3724 = vmatmul.mubr.msk.f32.vlgmr.msra.gmra.mrb[30].mxu1 %vm603_vm3, %v2527_v58 }
0x1533   :  { %v3725_v61 = vpop.f32.mrb[30].mxu1 }
0x1534   :  { %v2600_v62 = vpop.f32.mrb[31].mxu1 }
0x1535   :  { %3730 = vmatprep.mubr.msk.f32.mxu0 %vm603_vm3, %v2600_v62 }
0x1536   :  { %3731 = vmatmul.mubr.msk.f32.vlgmr.msra.gmra.mrb[20].mxu0 %vm603_vm3, %v3725_v61 }
0x1537   :  { %3994 = vmatpush3.bf16.msra.mxu0 %v3991_v60  ;;  %3737 = vmatprep.mubr.msk.f32.mxu0 %vm603_vm3, %v4719_v20  ;;  %v3297_v20 = vld [vmem:[%s4860_s11 + $0x28] sm:$0xff] }
0x1538   :  { %4004 = vmatprep.subr.bf16.mxu0 %v4003_v48 }
0x153e   :  { %3738 = vmatmul.mubr.msk.f32.vlgmr.msra.gmra.mrb[20].mxu0 %vm603_vm3, %v4717_v19 }
0x153f   :  { %4006 = vmatpush3.bf16.msra.mxu0 %v4003_v48 }
0x1540   :  { %4008 = vmatprep.subr.bf16.mxu0 %v4007_v45 }
0x1543   :  { %4010 = vmatpush3.bf16.msra.mxu0 %v4007_v45  ;;  %v3315_v45 = vld [vmem:[%s4853_s3 + $0x12] ss:$0 sm:$0xff] }
0x1544   :  { %4012 = vmatprep.subr.bf16.mxu0 %v4011_v47 }
0x1547   :  { %4014 = vmatpush3.bf16.msra.mxu0 %v4011_v47 }
0x1548   :  { %4016 = vmatprep.subr.bf16.mxu0 %v4015_v52 }
0x154b   :  { %4018 = vmatpush3.bf16.msra.mxu0 %v4015_v52 }
0x1611   :  { %v3739_v0 = vpop.f32.mrb[20].mxu0 }
0x1612   :  { %v2765_v36 = vpop.f32.mrb[21].mxu0  ;;  %v2780_v33 = vadd.f32 %v3739_v0, %v3293_v63 }
0x1613   :  { %v2779_v1 = vadd.f32 %v3293_v63, %v2765_v36 }
0x1614   :  { %v2782_v5 = vadd.f32 %v2780_v33, %v4625_v8  ;;  %v3296_v8 = vld [vmem:[%s4860_s11 + $0x20] sm:$0xff] }
0x1615   :  { %v2781_v2 = vadd.f32 %v2779_v1, %v4613_v3  ;;  %v3995_v21 = vpack.c.bf16 %v3297_v20, %v3296_v8 }
0x1616   :  { %v2786_v6 = vsel %vm67_vm0, %v2782_v5, 0.0 }
0x1617   :  { %v2783_v4 = vsel %vm67_vm0, %v2781_v2, 0.0  ;;  %3996 = vmatprep.subr.bf16.mxu1 %v3995_v21 }
0x1618   :  { %2784 = vadd.xlane.f32.xlu0 %v2783_v4  ;;  %3998 = vmatpush3.bf16.msra.mxu1 %v3995_v21 }
0x1619   :  { %4000 = vmatprep.subr.bf16.mxu1 %v3999_v16 }
0x161c   :  { %2787 = vadd.xlane.f32.xlu0 %v2786_v6  ;;  %4002 = vmatpush3.bf16.msra.mxu1 %v3999_v16 }
0x16a5   :  { %v2785_v7 = vpop.xlane.xlu0 %2784 }
0x16a6   :  { %v2789_v9 = vmul.f32 0.03125, %v2785_v7 }
0x16a8   :  { %v2791_v10 = vsub.f32 %v2781_v2, %v2789_v9 }
0x16a9   :  { %v2788_v12 = vpop.xlane.xlu0 %2787 }
0x16aa   :  { %v2790_v13 = vmul.f32 0.03125, %v2788_v12  ;;  %v2793_v14 = vmul.f32 %v2791_v10, %v2791_v10  ;;  %v3311_v12 = vld [vmem:[%s4853_s3 + $0x13] ss:$0 sm:$0xff] }
0x16ac   :  { %v2792_v17 = vsub.f32 %v2782_v5, %v2790_v13  ;;  %v2795_v18 = vsel %vm67_vm0, %v2793_v14, 0.0 }
0x16ad   :  { %2796 = vadd.xlane.f32.xlu0 %v2795_v18 }
0x16ae   :  { %v2794_v19 = vmul.f32 %v2792_v17, %v2792_v17 }
0x16b0   :  { %v2798_v3 = vsel %vm67_vm0, %v2794_v19, 0.0 }
0x16b1   :  { %2799 = vadd.xlane.f32.xlu0 %v2798_v3 }
0x173a   :  { %v2797_v23 = vpop.xlane.xlu0 %2796 }
0x173b   :  { %v2801_v24 = vmul.f32 0.03125, %v2797_v23 }
0x173d   :  { %v2803_v25 = vadd.f32 1e-05, %v2801_v24 }
0x173e   :  { %v2800_v26 = vpop.xlane.xlu0 %2799 }
0x173f   :  { %4084 = vrsqrt.f32 %v2803_v25  ;;  %v2802_v28 = vmul.f32 0.03125, %v2800_v26 }
0x1741   :  { %v2804_v29 = vadd.f32 1e-05, %v2802_v28 }
0x1743   :  { %4086 = vrsqrt.f32 %v2804_v29 }
0x1749   :  { %v4085_v30 = vpop.eup %4084 }
0x174a   :  { %v2807_v32 = vmul.f32 %v4085_v30, %v2791_v10  ;;  %v3069_v30 = vld [vmem:[%s4863_s13] sm:$0xff] }
0x174c   :  { %v2814_v35 = vmul.f32 %v3294_v31, %v2807_v32 }
0x174d   :  { %v4087_v38 = vpop.eup %4086 }
0x174e   :  { %v2808_v37 = vmul.f32 %v4087_v38, %v2792_v17  ;;  %v2821_v39 = vadd.f32 %v3295_v34, %v2814_v35  ;;  %v3072_v35 = vld [vmem:[%s4863_s13 + $0x18] sm:$0xff] }
0x1750   :  { %v2815_v41 = vmul.f32 %v3294_v31, %v2808_v37  ;;  %3748 = vmatprep.mubr.msk.f32.mxu1 %vm67_vm0, %v2821_v39  ;;  %v3070_v31 = vld [vmem:[%s4863_s13 + $0x8] sm:$0xff] }
0x1751   :  { %v4019_v32 = vpack.c.bf16 %v3070_v31, %v3069_v30 }
0x1752   :  { %v2822_v42 = vadd.f32 %v3295_v34, %v2815_v41  ;;  %v3071_v34 = vld [vmem:[%s4863_s13 + $0x10] sm:$0xff] }
0x1753   :  { %4020 = vmatprep.subr.bf16.mxu1 %v4019_v32  ;;  %v4023_v38 = vpack.c.bf16 %v3072_v35, %v3071_v34 }
0x1754   :  { %3749 = vmatmul.mubr.msk.f32.vlgmr.msra.gmra.mrb[32].mxu1 %vm67_vm0, %v2822_v42 }
0x1755   :  { %4022 = vmatpush3.bf16.msra.mxu1 %v4019_v32 }
0x1756   :  { %4024 = vmatprep.subr.bf16.mxu1 %v4023_v38 }
0x1759   :  { %4026 = vmatpush3.bf16.msra.mxu1 %v4023_v38 }
0x1827   :  { %v3750_v54 = vpop.f32.mrb[32].mxu1 }
0x1828   :  { %v2911_v55 = vadd.f32 %v3750_v54, %v3300_v53  ;;  %v2905_v56 = vpop.f32.mrb[33].mxu1 }
0x1829   :  { %v2906_v57 = vadd.f32 %v3300_v53, %v2905_v56  ;;  %v3316_v53 = vld [vmem:[%s4864_s14] ss:$0 sm:$0xff] }
0x182a   :  { %v2915_v58 = vmul.f32 %v2911_v55, %v2911_v55 }
0x182b   :  { %v2914_v40 = vmul.f32 %v2906_v57, %v2906_v57 }
0x182c   :  { %v2917_v59 = vmul.f32 %v2915_v58, %v2911_v55 }
0x182d   :  { %v2916_v60 = vmul.f32 %v2914_v40, %v2906_v57 }
0x182e   :  { %v2919_v61 = vmul.f32 0.044715, %v2917_v59 }
0x182f   :  { %v2918_v62 = vmul.f32 0.044715, %v2916_v60 }
0x1830   :  { %v2921_v63 = vadd.f32 %v2919_v61, %v2911_v55 }
0x1831   :  { %v2920_v0 = vadd.f32 %v2918_v62, %v2906_v57 }
0x1832   :  { %v2923_v36 = vmul.f32 0.7978846, %v2921_v63 }
0x1833   :  { %v2922_v33 = vmul.f32 0.7978846, %v2920_v0 }
0x1834   :  { %4088 = vtanh.f32 %v2923_v36 }
0x1835   :  { %4090 = vtanh.f32 %v2922_v33 }
0x183e   :  { %v4089_v1 = vpop.eup %4088 }
0x183f   :  { %v4091_v2 = vpop.eup %4090  ;;  %v2927_v4 = vadd.f32 1.0, %v4089_v1 }
0x1840   :  { %v2926_v5 = vadd.f32 1.0, %v4091_v2 }
0x1841   :  { %v2929_v6 = vmul.f32 0.5, %v2927_v4 }
0x1842   :  { %v2928_v7 = vmul.f32 0.5, %v2926_v5 }
0x1843   :  { %v2931_v10 = vmul.f32 %v2929_v6, %v2911_v55 }
0x1844   :  { %v2930_v9 = vmul.f32 %v2928_v7, %v2906_v57 }
0x1846   :  { %3767 = vmatprep.mubr.msk.f32.mxu0 %vm69_vm1, %v2930_v9 }
0x1847   :  { %3768 = vmatmul.mubr.msk.f32.vlgmr.msra.gmra.mrb[22].mxu0 %vm69_vm1, %v2931_v10 }
0x191a   :  { %v3769_v13 = vpop.f32.mrb[22].mxu0 }
0x191b   :  { %v3024_v14 = vadd.f32 %v3769_v13, %v3311_v12  ;;  %v3018_v17 = vpop.f32.mrb[23].mxu0 }
0x191c   :  { %v3019_v18 = vadd.f32 %v3311_v12, %v3018_v17 }
0x191d   :  { %v3028_v19 = vadd.f32 %v3024_v14, %v2822_v42 }
0x191e   :  { %v3027_v3 = vadd.f32 %v3019_v18, %v2821_v39 }
0x191f   :  { %v3032_v8 = vsel %vm67_vm0, %v3028_v19, 0.0 }
0x1920   :  { %3033 = vadd.xlane.f32.xlu0 %v3032_v8  ;;  %v3029_v20 = vsel %vm67_vm0, %v3027_v3, 0.0 }
0x1921   :  { %3030 = vadd.xlane.f32.xlu1 %v3029_v20 }
0x19ad   :  { %v3034_v21 = vpop.xlane.xlu0 %3033 }
0x19ae   :  { %v3036_v22 = vmul.f32 0.03125, %v3034_v21  ;;  %v3031_v15 = vpop.xlane.xlu1 %3030 }
0x19af   :  { %v3035_v16 = vmul.f32 0.03125, %v3031_v15 }
0x19b0   :  { %v3038_v23 = vsub.f32 %v3028_v19, %v3036_v22 }
0x19b1   :  { %v3037_v24 = vsub.f32 %v3027_v3, %v3035_v16 }
0x19b2   :  { %v3040_v28 = vmul.f32 %v3038_v23, %v3038_v23 }
0x19b3   :  { %v3039_v25 = vmul.f32 %v3037_v24, %v3037_v24 }
0x19b4   :  { %v3044_v29 = vsel %vm67_vm0, %v3040_v28, 0.0 }
0x19b5   :  { %v3041_v26 = vsel %vm67_vm0, %v3039_v25, 0.0 }
0x19b6   :  { %3042 = vadd.xlane.f32.xlu0 %v3041_v26 }
0x19ba   :  { %3045 = vadd.xlane.f32.xlu0 %v3044_v29 }
0x1a43   :  { %v3043_v37 = vpop.xlane.xlu0 %3042 }
0x1a44   :  { %v3047_v39 = vmul.f32 0.03125, %v3043_v37 }
0x1a46   :  { %v3049_v41 = vadd.f32 1e-05, %v3047_v39 }
0x1a47   :  { %v3046_v42 = vpop.xlane.xlu0 %3045 }
0x1a48   :  { %4092 = vrsqrt.f32 %v3049_v41  ;;  %v3048_v43 = vmul.f32 0.03125, %v3046_v42 }
0x1a4a   :  { %v3050_v27 = vadd.f32 1e-05, %v3048_v43 }
0x1a4c   :  { %4094 = vrsqrt.f32 %v3050_v27 }
0x1a52   :  { %v4093_v48 = vpop.eup %4092 }
0x1a53   :  { %v3053_v44 = vmul.f32 %v4093_v48, %v3037_v24 }
0x1a55   :  { %v3060_v46 = vmul.f32 %v3314_v51, %v3053_v44 }
0x1a56   :  { %v4095_v11 = vpop.eup %4094 }
0x1a57   :  { %v3054_v47 = vmul.f32 %v4095_v11, %v3038_v23  ;;  %v3067_v49 = vadd.f32 %v3315_v45, %v3060_v46 }
0x1a59   :  { %v3061_v50 = vmul.f32 %v3314_v51, %v3054_v47  ;;  %3778 = vmatprep.mubr.msk.f32.mxu1 %vm67_vm0, %v3067_v49 }
0x1a5b   :  { %v3068_v52 = vadd.f32 %v3315_v45, %v3061_v50 }
0x1a5d   :  { %3779 = vmatmul.mubr.msk.f32.vlgmr.msra.gmra.mrb[34].mxu1 %vm67_vm0, %v3068_v52 }
0x1b30   :  { %v3780_v54 = vpop.f32.mrb[34].mxu1 }
0x1b31   :  { %v3158_v55 = vadd.f32 %v3780_v54, %v3316_v53  ;;  %v3152_v56 = vpop.f32.mrb[35].mxu1 }
0x1b32   :  { %v3153_v57 = vadd.f32 %v3316_v53, %v3152_v56 }
0x1b33   :  { %3162 = vst [vmem:[%s4865_s15 + $0x8] sm:$0xff] %v3158_v55 }
0x1b34   :  { %3161 = vst [vmem:[%s4865_s15] sm:$0xff] %v3153_v57 }

</bundles_post_ra>
